<compile_context>
chip_gen: v6e
topology: v6e:2x2x1
jax: 0.10.0
libtpu: 0.0.40
codegen_flags: <defaults>
</compile_context>

<pallas_src>
import functools
import math

import jax
import jax.numpy as jnp
from jax.experimental import pallas as pl
from jax.experimental.pallas import tpu as pltpu


_COMPUTE_DTYPE = jnp.bfloat16   # MXU operand dtype; accumulation stays f32.


# ----------------------------- kernel helpers --------------------------------


def _layer_norm(x, gamma, beta, eps):
    mu = jnp.mean(x, axis=-1, keepdims=True)
    var = jnp.mean((x - mu) ** 2, axis=-1, keepdims=True)
    return (x - mu) * jax.lax.rsqrt(var + eps) * gamma + beta


def _gelu_exact(x):
    # PyTorch F.gelu default (approximate='none'), erf-based.
    return 0.5 * x * (1.0 + jax.lax.erf(x * (1.0 / math.sqrt(2.0))))


# ----------------------------- fused kernel ----------------------------------


def fused_encoder_kernel(
    # inputs (block shapes)
    src_ref,          # (B_t, L, E)     layer-0 activations for this batch tile
    in_wt_ref,        # (1, E, 3E)      in_proj weight^T, bf16, q-scale folded in
    in_b_ref,         # (1, 1, 3E)      f32, q-scale folded in
    out_wt_ref,       # (1, H, Dh, E)   out_proj weight^T per head, bf16
    out_b_ref,        # (1, 1, E)       f32
    ln1_g_ref,        # (1, 1, E)
    ln1_b_ref,        # (1, 1, E)
    w1t_ref,          # (1, E, F)       linear1 weight^T, bf16
    b1_ref,           # (1, 1, F)
    w2t_ref,          # (1, F, E)       linear2 weight^T, bf16
    b2_ref,           # (1, 1, E)
    ln2_g_ref,        # (1, 1, E)
    ln2_b_ref,        # (1, 1, E)
    # outputs
    out_all_ref,      # (1, B_t, L, E)  or (B_t, L, E) if only_last
    attn_all_ref,     # (1, B_t, L, L)  or (B_t, L, L) if only_last
    # scratch
    act_ref,          # VMEM (B_t*L, E) f32 — activations, resident across layers
    *,
    num_heads,
    eps,
    only_last,
):
    layer = pl.program_id(1)
    num_layers = pl.num_programs(1)

    B_t, L, E = src_ref.shape
    H = num_heads
    Dh = E // H
    M = B_t * L            # matmul M dimension (all batch-tile rows together)
    G = H * B_t            # merged (head, batch) attention batch axis

    # Load the source activations once per batch tile (layer 0 only); all
    # subsequent layers read the VMEM-resident activations.
    @pl.when(layer == 0)
    def _():
        act_ref[...] = src_ref[...].reshape(M, E).astype(jnp.float32)

    x = act_ref[...]                                         # (M, E) f32
    x_c = x.astype(_COMPUTE_DTYPE)

    # --- self attention -------------------------------------------------------
    qkv = jnp.dot(x_c, in_wt_ref[0],
                  preferred_element_type=jnp.float32) + in_b_ref[0]     # (M, 3E)

    def split_heads(start):
        # (M, E slice) -> (G, L, Dh) with g = h * B_t + b.  H lane slices plus
        # a major-axis stack and a leading-dim reshape (L % 8 keeps it layout
        # preserving); the attention math below is 3-D batched over g.
        parts = [qkv[:, start + h * Dh:start + (h + 1) * Dh] for h in range(H)]
        return jnp.stack(parts, axis=0).reshape(G, L, Dh)

    q = split_heads(0).astype(_COMPUTE_DTYPE)
    k = split_heads(E).astype(_COMPUTE_DTYPE)
    v = split_heads(2 * E).astype(_COMPUTE_DTYPE)

    # Scores for all (head, batch) pairs in one batched contraction
    # (1/sqrt(Dh) already folded into the q projection).
    s = jnp.einsum("gqd,gkd->gqk", q, k,
                   preferred_element_type=jnp.float32)                  # (G, L, L)
    s = s - jnp.max(s, axis=-1, keepdims=True)
    p = jnp.exp(s)
    # Exact normalization: divide only the small (G, L, 1) denominator, then
    # broadcast-multiply (rows sum to 1 up to f32 rounding, like PyTorch).
    p = p * (1.0 / jnp.sum(p, axis=-1, keepdims=True))

    # Head-averaged attention weights (matches PyTorch average_attn_weights=True).
    attn_avg = jnp.mean(p.reshape(H, B_t, L, L), axis=0)                # (B_t, L, L)

    ctx = jnp.einsum("gqk,gkd->gqd", p.astype(_COMPUTE_DTYPE), v,
                     preferred_element_type=jnp.float32)                # (G, L, Dh)

    # Output projection with the head merge fused in:
    #   attn_out = sum_h ctx_h @ W_out[h]   (no lane concatenate, f32 accumulate)
    acc = None
    for h in range(H):
        ctx_h = ctx[h * B_t:(h + 1) * B_t].reshape(M, Dh).astype(_COMPUTE_DTYPE)
        part = jnp.dot(ctx_h, out_wt_ref[0, h],
                       preferred_element_type=jnp.float32)              # (M, E)
        acc = part if acc is None else acc + part
    attn_out = acc + out_b_ref[0]

    # residual + norm1  (dropout1 == identity in eval mode)
    h1 = _layer_norm(x + attn_out, ln1_g_ref[0], ln1_b_ref[0], eps)

    # --- feed forward -----------------------------------------------------------
    ff = jnp.dot(h1.astype(_COMPUTE_DTYPE), w1t_ref[0],
                 preferred_element_type=jnp.float32) + b1_ref[0]
    ff = _gelu_exact(ff)
    ff = jnp.dot(ff.astype(_COMPUTE_DTYPE), w2t_ref[0],
                 preferred_element_type=jnp.float32) + b2_ref[0]

    # residual + norm2  (dropout2 == identity in eval mode)
    h2 = _layer_norm(h1 + ff, ln2_g_ref[0], ln2_b_ref[0], eps)

    act_ref[...] = h2                                       # carry to next layer

    out_block = h2.reshape(B_t, L, E).astype(out_all_ref.dtype)
    attn_block = attn_avg.astype(attn_all_ref.dtype)

    if only_last:
        # Output block index is constant along the layer axis -> VMEM-resident,
        # written back to HBM once per batch tile; store only the final layer.
        @pl.when(layer == num_layers - 1)
        def _():
            out_all_ref[...] = out_block
            attn_all_ref[...] = attn_block
    else:
        out_all_ref[0] = out_block
        attn_all_ref[0] = attn_block


# ------------------------------- wrapper --------------------------------------


_WEIGHT_ORDER = ("in_wt", "in_b", "out_wt", "out_b", "ln1_g", "ln1_b",
                 "w1t", "b1", "w2t", "b2", "ln2_g", "ln2_b")


def _pick_b_tile(batch, seq_len, target_rows=256, max_rows=512):
    """Batch-tile heuristic: smallest divisor of `batch` whose row count
    B_tile*L reaches the MXU-filling target (<= max_rows); otherwise the
    largest divisor that still fits the row cap (weight-DMA amortization)."""
    divisors = [d for d in range(1, batch + 1) if batch % d == 0]
    for d in divisors:
        if target_rows <= d * seq_len <= max_rows:
            return d
    fitting = [d for d in divisors if d * seq_len <= max_rows]
    return fitting[-1] if fitting else 1


def _estimate_vmem_limit(weights, src_dtype, b_tile, seq_len, hidden, num_heads, ff):
    """Rough VMEM budget: double-buffered weight + I/O blocks, scratch, and
    f32 intermediates, with headroom; clamped to a safe range."""
    act_item = jnp.dtype(src_dtype).itemsize
    m = b_tile * seq_len
    g = num_heads * b_tile
    dh = hidden // num_heads
    weight_block = sum(math.prod(w.shape[1:]) * jnp.dtype(w.dtype).itemsize
                       for w in weights)
    io_block = (m * hidden + m * seq_len) * act_item * 2      # src + outputs
    scratch = 4 * m * hidden
    interm = 4 * (m * 3 * hidden + m * ff + 3 * g * seq_len * dh
                  + 2 * g * seq_len * seq_len + 6 * m * hidden)
    est = 2 * (weight_block + io_block) + scratch + interm
    # TODO(synk): on v7x (64 MiB physical VMEM) keep this below ~48 MiB by
    # shrinking b_tile or passing weight_buffer_count=1.
    return max(32 * 1024 * 1024, min(int(est * 1.25), 96 * 1024 * 1024))


def _encoder_pallas(src, stacked_params, *, num_heads, eps, only_last,
                    b_tile=None, weight_buffer_count=None):
    """Runs the whole layer stack in one pallas_call."""
    B, L, E = src.shape
    assert E % num_heads == 0
    num_layers = stacked_params["in_wt"].shape[0]
    ff_size = stacked_params["w1t"].shape[-1]
    weights = [stacked_params[name] for name in _WEIGHT_ORDER]

    if b_tile is None:
        b_tile = _pick_b_tile(B, L)
    assert B % b_tile == 0
    n_btiles = B // b_tile

    def weight_spec(w):
        # One layer's slice per grid step, selected by the layer coordinate;
        # independent of the batch-tile axis so each fetch is amortized over
        # B_tile batch elements.
        n_trailing = w.ndim - 1

        def idx(bt, l, _n=n_trailing):
            return (l,) + (0,) * _n

        if weight_buffer_count is None:
            return pl.BlockSpec((1,) + w.shape[1:], idx)
        return pl.BlockSpec((1,) + w.shape[1:], idx,
                            pipeline_mode=pl.Buffered(weight_buffer_count))

    in_specs = [pl.BlockSpec((b_tile, L, E), lambda bt, l: (bt, 0, 0))]
    in_specs += [weight_spec(w) for w in weights]

    if only_last:
        out_specs = (
            pl.BlockSpec((b_tile, L, E), lambda bt, l: (bt, 0, 0)),
            pl.BlockSpec((b_tile, L, L), lambda bt, l: (bt, 0, 0)),
        )
        out_shape = (
            jax.ShapeDtypeStruct((B, L, E), src.dtype),
            jax.ShapeDtypeStruct((B, L, L), src.dtype),
        )
    else:
        out_specs = (
            pl.BlockSpec((1, b_tile, L, E), lambda bt, l: (l, bt, 0, 0)),
            pl.BlockSpec((1, b_tile, L, L), lambda bt, l: (l, bt, 0, 0)),
        )
        out_shape = (
            jax.ShapeDtypeStruct((num_layers, B, L, E), src.dtype),
            jax.ShapeDtypeStruct((num_layers, B, L, L), src.dtype),
        )

    kernel = functools.partial(fused_encoder_kernel, num_heads=num_heads,
                               eps=eps, only_last=only_last)

    return pl.pallas_call(
        kernel,
        grid=(n_btiles, num_layers),
        in_specs=in_specs,
        out_specs=out_specs,
        out_shape=out_shape,
        scratch_shapes=[pltpu.VMEM((b_tile * L, E), jnp.float32)],
        compiler_params=pltpu.CompilerParams(
            # batch-tile axis parallel (megacore-shardable); layer axis
            # arbitrary (activations carried in VMEM scratch across it).
            dimension_semantics=("parallel", "arbitrary"),
            vmem_limit_bytes=_estimate_vmem_limit(
                weights, src.dtype, b_tile, L, E, num_heads, ff_size),
        ),
    )(src, *weights)


def transformer_encoder(src, stacked_params, *, num_heads, eps,
                        only_output_last=False, b_tile=None,
                        weight_buffer_count=None):
    """Mirrors TransformerEncoder.forward: returns
    (src, attn_weights, all_outputs, all_attn_weights)."""
    assert isinstance(only_output_last, bool)
    if only_output_last:
        # Last-only variant: per-layer HBM writeback is skipped entirely.
        out_last, attn_last = _encoder_pallas(
            src, stacked_params, num_heads=num_heads, eps=eps, only_last=True,
            b_tile=b_tile, weight_buffer_count=weight_buffer_count)
        return out_last, attn_last, [], []

    out_all, attn_all = _encoder_pallas(
        src, stacked_params, num_heads=num_heads, eps=eps, only_last=False,
        b_tile=b_tile, weight_buffer_count=weight_buffer_count)
    num_layers = out_all.shape[0]
    all_outputs = [out_all[i] for i in range(num_layers)]
    all_attn = [attn_all[i] for i in range(num_layers)]
    return out_all[-1], attn_all[-1], all_outputs, all_attn


# --------------------------- parameter init / prep -----------------------------


def init_layer_params(key, hidden_size, feedforward_size, init_range=0.02):
    E, F = hidden_size, feedforward_size
    ks = jax.random.split(key, 6)
    # stored already transposed (in_dim, out_dim) for the kernel: y = x @ W + b
    in_wt = jax.random.normal(ks[0], (E, 3 * E), jnp.float32) * init_range
    out_wt = jax.random.normal(ks[1], (E, E), jnp.float32) * init_range
    w1t = jax.random.normal(ks[2], (E, F), jnp.float32) * init_range
    w2t = jax.random.normal(ks[3], (F, E), jnp.float32) * init_range
    in_b = jax.random.normal(ks[4], (1, 3 * E), jnp.float32) * init_range
    out_b = jnp.zeros((1, E), jnp.float32)
    b1 = jax.random.normal(ks[5], (1, F), jnp.float32) * init_range
    b2 = jnp.zeros((1, E), jnp.float32)
    return {
        "in_wt": in_wt, "in_b": in_b,
        "out_wt": out_wt, "out_b": out_b,
        "ln1_g": jnp.ones((1, E), jnp.float32),
        "ln1_b": jnp.zeros((1, E), jnp.float32),
        "w1t": w1t, "b1": b1,
        "w2t": w2t, "b2": b2,
        "ln2_g": jnp.ones((1, E), jnp.float32),
        "ln2_b": jnp.zeros((1, E), jnp.float32),
    }


def stack_layer_params(layer_params, *, num_heads,
                       compute_dtype=_COMPUTE_DTYPE):
    """Stack per-layer params on a leading layer axis, fold the 1/sqrt(Dh)
    attention scale into the q projection (host side, f32), reshape the
    out_proj weight to (H, Dh, E) so the kernel fuses the head merge into the
    projection, and cast matmul weights to the MXU compute dtype (biases /
    LN params stay f32)."""
    E = layer_params[0]["in_wt"].shape[0]
    Dh = E // num_heads
    scale = 1.0 / math.sqrt(Dh)

    matmul_keys = {"in_wt", "out_wt", "w1t", "w2t"}
    prepared = []
    for p in layer_params:
        p = dict(p)
        p["in_wt"] = p["in_wt"].at[:, :E].multiply(scale)
        p["in_b"] = p["in_b"].at[:, :E].multiply(scale)
        p["out_wt"] = p["out_wt"].reshape(num_heads, Dh, E)
        prepared.append(p)

    stacked = {}
    for name in prepared[0]:
        arr = jnp.stack([p[name] for p in prepared], axis=0)
        if name in matmul_keys:
            arr = arr.astype(compute_dtype)
        stacked[name] = arr
    return stacked


# ------------------------------- main -----------------------------------------


if __name__ == "__main__":
    # small config consistent with the module's constructor
    hidden_size = 32
    num_hidden_layer = 2
    num_hidden_head = 4
    feedforward_size = 64
    layer_norm_eps = 1e-12

    batch, seq = 2, 8

    root = jax.random.PRNGKey(0)
    kx, *layer_keys = jax.random.split(root, num_hidden_layer + 1)

    src = jax.random.normal(kx, (batch, seq, hidden_size), jnp.float32)
    layer_params = [
        init_layer_params(k, hidden_size, feedforward_size)
        for k in layer_keys
    ]
    stacked_params = stack_layer_params(layer_params,
                                        num_heads=num_hidden_head)

    # Full-output variant (default forward semantics).
    out, attn_w, all_outputs, all_attn = transformer_encoder(
        src, stacked_params, num_heads=num_hidden_head, eps=layer_norm_eps)

    jax.block_until_ready(out)
    jax.block_until_ready(attn_w)
    for o in all_outputs:
        jax.block_until_ready(o)
    for a in all_attn:
        jax.block_until_ready(a)

    assert out.shape == (batch, seq, hidden_size)
    assert attn_w.shape == (batch, seq, seq)
    assert len(all_outputs) == num_hidden_layer
    assert len(all_attn) == num_hidden_layer
    assert all(o.shape == (batch, seq, hidden_size) for o in all_outputs)
    assert all(a.shape == (batch, seq, seq) for a in all_attn)

    # Last-only variant (per-layer HBM writeback skipped).
    out_last, attn_last, empty_outs, empty_attn = transformer_encoder(
        src, stacked_params, num_heads=num_hidden_head, eps=layer_norm_eps,
        only_output_last=True)
    jax.block_until_ready(out_last)
    jax.block_until_ready(attn_last)

    assert out_last.shape == (batch, seq, hidden_size)
    assert attn_last.shape == (batch, seq, seq)
    assert empty_outs == [] and empty_attn == []
    assert jnp.allclose(out_last, out, atol=1e-3, rtol=1e-3)
    assert jnp.allclose(attn_last, attn_w, atol=1e-3, rtol=1e-3)

    print("KERNEL_OK")
</pallas_src>

<mosaic_0001>
module attributes {stable_mosaic.version = 11 : i64} {
  func.func @fused_encoder_kernel(%arg0: i32, %arg1: i32, %arg2: memref<2x8x32xf32, #tpu.memory_space<vmem>>, %arg3: memref<1x32x96xbf16, #tpu.memory_space<vmem>>, %arg4: memref<1x1x96xf32, #tpu.memory_space<vmem>>, %arg5: memref<1x4x8x32xbf16, #tpu.memory_space<vmem>>, %arg6: memref<1x1x32xf32, #tpu.memory_space<vmem>>, %arg7: memref<1x1x32xf32, #tpu.memory_space<vmem>>, %arg8: memref<1x1x32xf32, #tpu.memory_space<vmem>>, %arg9: memref<1x32x64xbf16, #tpu.memory_space<vmem>>, %arg10: memref<1x1x64xf32, #tpu.memory_space<vmem>>, %arg11: memref<1x64x32xbf16, #tpu.memory_space<vmem>>, %arg12: memref<1x1x32xf32, #tpu.memory_space<vmem>>, %arg13: memref<1x1x32xf32, #tpu.memory_space<vmem>>, %arg14: memref<1x1x32xf32, #tpu.memory_space<vmem>>, %arg15: memref<1x2x8x32xf32, #tpu.memory_space<vmem>>, %arg16: memref<1x2x8x8xf32, #tpu.memory_space<vmem>>, %arg17: memref<16x32xf32, #tpu.memory_space<vmem>>) attributes {dimension_semantics = [#tpu.dimension_semantics<parallel>, #tpu.dimension_semantics<arbitrary>], iteration_bounds = array<i64: 1, 2>, scalar_prefetch = 0 : i64, scratch_operands = 1 : i64, tpu.core_type = #tpu.core_type<tc>, window_params = [{transform_indices = @transform_0, window_bounds = array<i64: 2, 8, 32>}, {transform_indices = @transform_1, window_bounds = array<i64: 1, 32, 96>}, {transform_indices = @transform_2, window_bounds = array<i64: 1, 1, 96>}, {transform_indices = @transform_3, window_bounds = array<i64: 1, 4, 8, 32>}, {transform_indices = @transform_4, window_bounds = array<i64: 1, 1, 32>}, {transform_indices = @transform_5, window_bounds = array<i64: 1, 1, 32>}, {transform_indices = @transform_6, window_bounds = array<i64: 1, 1, 32>}, {transform_indices = @transform_7, window_bounds = array<i64: 1, 32, 64>}, {transform_indices = @transform_8, window_bounds = array<i64: 1, 1, 64>}, {transform_indices = @transform_9, window_bounds = array<i64: 1, 64, 32>}, {transform_indices = @transform_10, window_bounds = array<i64: 1, 1, 32>}, {transform_indices = @transform_11, window_bounds = array<i64: 1, 1, 32>}, {transform_indices = @transform_12, window_bounds = array<i64: 1, 1, 32>}, {transform_indices = @transform_13, window_bounds = array<i64: 1, 2, 8, 32>}, {transform_indices = @transform_14, window_bounds = array<i64: 1, 2, 8, 8>}]} {
    %c0_i32 = arith.constant 0 : i32
    %0 = arith.cmpi eq, %arg1, %c0_i32 : i32
    %1 = arith.extui %0 : i1 to i32
    %c0_i32_0 = arith.constant 0 : i32
    %2 = arith.cmpi ne, %1, %c0_i32_0 : i32
    scf.if %2 {
      %c0_84 = arith.constant 0 : index
      %c0_85 = arith.constant 0 : index
      %c0_86 = arith.constant 0 : index
      %180 = vector.load %arg2[%c0_84, %c0_85, %c0_86] : memref<2x8x32xf32, #tpu.memory_space<vmem>>, vector<2x8x32xf32>
      %181 = vector.shape_cast %180 : vector<2x8x32xf32> to vector<16x32xf32>
      %c0_87 = arith.constant 0 : index
      %c0_88 = arith.constant 0 : index
      %182 = vector.load %arg17[%c0_87, %c0_88] : memref<16x32xf32, #tpu.memory_space<vmem>>, vector<16x32xf32>
      tpu.vector_store %arg17[%c0_87, %c0_88], %181 {strides = array<i32>} : memref<16x32xf32, #tpu.memory_space<vmem>>, vector<16x32xf32>,
    } else {
    }
    %c0 = arith.constant 0 : index
    %c0_1 = arith.constant 0 : index
    %3 = vector.load %arg17[%c0, %c0_1] : memref<16x32xf32, #tpu.memory_space<vmem>>, vector<16x32xf32>
    %4 = arith.truncf %3 : vector<16x32xf32> to vector<16x32xbf16>
    %c0_2 = arith.constant 0 : index
    %c0_3 = arith.constant 0 : index
    %c0_4 = arith.constant 0 : index
    %5 = vector.load %arg3[%c0_2, %c0_3, %c0_4] : memref<1x32x96xbf16, #tpu.memory_space<vmem>>, vector<1x32x96xbf16>
    %6 = vector.shape_cast %5 : vector<1x32x96xbf16> to vector<32x96xbf16>
    %cst = arith.constant dense<0.000000e+00> : vector<16x96xf32>
    %7 = tpu.matmul %4, %6, %cst {dimension_numbers = #tpu.dot_dimension_numbers<[1], [0], [0], [1], [0, 0, 1, 1], [], []>} : vector<16x32xbf16>, vector<32x96xbf16>, vector<16x96xf32> -> vector<16x96xf32>
    %c0_5 = arith.constant 0 : index
    %c0_6 = arith.constant 0 : index
    %c0_7 = arith.constant 0 : index
    %8 = vector.load %arg4[%c0_5, %c0_6, %c0_7] : memref<1x1x96xf32, #tpu.memory_space<vmem>>, vector<1x1x96xf32>
    %9 = vector.shape_cast %8 : vector<1x1x96xf32> to vector<1x96xf32>
    %10 = vector.broadcast %9 : vector<1x96xf32> to vector<16x96xf32>
    %11 = arith.addf %7, %10 : vector<16x96xf32>
    %12 = vector.extract_strided_slice %11 {offsets = [0, 0], sizes = [16, 8], strides = [1, 1]} : vector<16x96xf32> to vector<16x8xf32>
    %13 = vector.extract_strided_slice %11 {offsets = [0, 8], sizes = [16, 8], strides = [1, 1]} : vector<16x96xf32> to vector<16x8xf32>
    %14 = vector.extract_strided_slice %11 {offsets = [0, 16], sizes = [16, 8], strides = [1, 1]} : vector<16x96xf32> to vector<16x8xf32>
    %15 = vector.extract_strided_slice %11 {offsets = [0, 24], sizes = [16, 8], strides = [1, 1]} : vector<16x96xf32> to vector<16x8xf32>
    %16 = vector.shape_cast %12 : vector<16x8xf32> to vector<1x16x8xf32>
    %17 = vector.shape_cast %13 : vector<16x8xf32> to vector<1x16x8xf32>
    %18 = vector.shape_cast %14 : vector<16x8xf32> to vector<1x16x8xf32>
    %19 = vector.shape_cast %15 : vector<16x8xf32> to vector<1x16x8xf32>
    %20 = tpu.concatenate %16, %17, %18, %19 in 0 : vector<1x16x8xf32>, vector<1x16x8xf32>, vector<1x16x8xf32>, vector<1x16x8xf32> -> vector<4x16x8xf32>
    %21 = vector.shape_cast %20 : vector<4x16x8xf32> to vector<8x8x8xf32>
    %22 = arith.truncf %21 : vector<8x8x8xf32> to vector<8x8x8xbf16>
    %23 = vector.extract_strided_slice %11 {offsets = [0, 32], sizes = [16, 8], strides = [1, 1]} : vector<16x96xf32> to vector<16x8xf32>
    %24 = vector.extract_strided_slice %11 {offsets = [0, 40], sizes = [16, 8], strides = [1, 1]} : vector<16x96xf32> to vector<16x8xf32>
    %25 = vector.extract_strided_slice %11 {offsets = [0, 48], sizes = [16, 8], strides = [1, 1]} : vector<16x96xf32> to vector<16x8xf32>
    %26 = vector.extract_strided_slice %11 {offsets = [0, 56], sizes = [16, 8], strides = [1, 1]} : vector<16x96xf32> to vector<16x8xf32>
    %27 = vector.shape_cast %23 : vector<16x8xf32> to vector<1x16x8xf32>
    %28 = vector.shape_cast %24 : vector<16x8xf32> to vector<1x16x8xf32>
    %29 = vector.shape_cast %25 : vector<16x8xf32> to vector<1x16x8xf32>
    %30 = vector.shape_cast %26 : vector<16x8xf32> to vector<1x16x8xf32>
    %31 = tpu.concatenate %27, %28, %29, %30 in 0 : vector<1x16x8xf32>, vector<1x16x8xf32>, vector<1x16x8xf32>, vector<1x16x8xf32> -> vector<4x16x8xf32>
    %32 = vector.shape_cast %31 : vector<4x16x8xf32> to vector<8x8x8xf32>
    %33 = arith.truncf %32 : vector<8x8x8xf32> to vector<8x8x8xbf16>
    %34 = vector.extract_strided_slice %11 {offsets = [0, 64], sizes = [16, 8], strides = [1, 1]} : vector<16x96xf32> to vector<16x8xf32>
    %35 = vector.extract_strided_slice %11 {offsets = [0, 72], sizes = [16, 8], strides = [1, 1]} : vector<16x96xf32> to vector<16x8xf32>
    %36 = vector.extract_strided_slice %11 {offsets = [0, 80], sizes = [16, 8], strides = [1, 1]} : vector<16x96xf32> to vector<16x8xf32>
    %37 = vector.extract_strided_slice %11 {offsets = [0, 88], sizes = [16, 8], strides = [1, 1]} : vector<16x96xf32> to vector<16x8xf32>
    %38 = vector.shape_cast %34 : vector<16x8xf32> to vector<1x16x8xf32>
    %39 = vector.shape_cast %35 : vector<16x8xf32> to vector<1x16x8xf32>
    %40 = vector.shape_cast %36 : vector<16x8xf32> to vector<1x16x8xf32>
    %41 = vector.shape_cast %37 : vector<16x8xf32> to vector<1x16x8xf32>
    %42 = tpu.concatenate %38, %39, %40, %41 in 0 : vector<1x16x8xf32>, vector<1x16x8xf32>, vector<1x16x8xf32>, vector<1x16x8xf32> -> vector<4x16x8xf32>
    %43 = vector.shape_cast %42 : vector<4x16x8xf32> to vector<8x8x8xf32>
    %44 = arith.truncf %43 : vector<8x8x8xf32> to vector<8x8x8xbf16>
    "tpu.trace_start"() <{level = 10 : i32, message = "gqd,gkd->gqk"}> : () -> ()
    %cst_8 = arith.constant dense<0.000000e+00> : vector<8x8x8xf32>
    %45 = tpu.matmul %22, %33, %cst_8 {dimension_numbers = #tpu.dot_dimension_numbers<[2], [2], [1], [1], [0, 0, 0, 1, 1, 1], [0], [0]>} : vector<8x8x8xbf16>, vector<8x8x8xbf16>, vector<8x8x8xf32> -> vector<8x8x8xf32>
    "tpu.trace_stop"() : () -> ()
    %cst_9 = arith.constant dense<0xFF800000> : vector<8x8xf32>
    %46 = vector.multi_reduction <maximumf>, %45, %cst_9 [2] : vector<8x8x8xf32> to vector<8x8xf32>
    %47 = vector.shape_cast %46 : vector<8x8xf32> to vector<8x8x1xf32>
    %48 = vector.broadcast %47 : vector<8x8x1xf32> to vector<8x8x8xf32>
    %49 = arith.subf %45, %48 : vector<8x8x8xf32>
    %50 = math.exp %49 : vector<8x8x8xf32>
    %cst_10 = arith.constant dense<0.000000e+00> : vector<8x8xf32>
    %51 = vector.multi_reduction <add>, %50, %cst_10 [2] : vector<8x8x8xf32> to vector<8x8xf32>
    %52 = vector.shape_cast %51 : vector<8x8xf32> to vector<8x8x1xf32>
    %cst_11 = arith.constant 1.000000e+00 : f32
    %53 = vector.broadcast %cst_11 : f32 to vector<8x8x1xf32>
    %54 = arith.divf %53, %52 : vector<8x8x1xf32>
    %55 = vector.broadcast %54 : vector<8x8x1xf32> to vector<8x8x8xf32>
    %56 = arith.mulf %50, %55 : vector<8x8x8xf32>
    %57 = vector.shape_cast %56 : vector<8x8x8xf32> to vector<4x2x8x8xf32>
    %cst_12 = arith.constant dense<0.000000e+00> : vector<2x8x8xf32>
    %58 = vector.multi_reduction <add>, %57, %cst_12 [0] : vector<4x2x8x8xf32> to vector<2x8x8xf32>
    %cst_13 = arith.constant 4.000000e+00 : f32
    %59 = vector.broadcast %cst_13 : f32 to vector<2x8x8xf32>
    %60 = arith.divf %58, %59 : vector<2x8x8xf32>
    %61 = arith.truncf %56 : vector<8x8x8xf32> to vector<8x8x8xbf16>
    "tpu.trace_start"() <{level = 10 : i32, message = "gqk,gkd->gqd"}> : () -> ()
    %cst_14 = arith.constant dense<0.000000e+00> : vector<8x8x8xf32>
    %62 = tpu.matmul %61, %44, %cst_14 {dimension_numbers = #tpu.dot_dimension_numbers<[2], [1], [1], [2], [0, 0, 0, 1, 1, 2], [0], [0]>} : vector<8x8x8xbf16>, vector<8x8x8xbf16>, vector<8x8x8xf32> -> vector<8x8x8xf32>
    "tpu.trace_stop"() : () -> ()
    %63 = vector.extract_strided_slice %62 {offsets = [0, 0, 0], sizes = [2, 8, 8], strides = [1, 1, 1]} : vector<8x8x8xf32> to vector<2x8x8xf32>
    %64 = vector.shape_cast %63 : vector<2x8x8xf32> to vector<16x8xf32>
    %65 = arith.truncf %64 : vector<16x8xf32> to vector<16x8xbf16>
    %c0_15 = arith.constant 0 : index
    %c0_16 = arith.constant 0 : index
    %c0_17 = arith.constant 0 : index
    %c0_18 = arith.constant 0 : index
    %66 = vector.load %arg5[%c0_15, %c0_16, %c0_17, %c0_18] : memref<1x4x8x32xbf16, #tpu.memory_space<vmem>>, vector<1x1x8x32xbf16>
    %67 = vector.shape_cast %66 : vector<1x1x8x32xbf16> to vector<8x32xbf16>
    %cst_19 = arith.constant dense<0.000000e+00> : vector<16x32xf32>
    %68 = tpu.matmul %65, %67, %cst_19 {dimension_numbers = #tpu.dot_dimension_numbers<[1], [0], [0], [1], [0, 0, 1, 1], [], []>} : vector<16x8xbf16>, vector<8x32xbf16>, vector<16x32xf32> -> vector<16x32xf32>
    %69 = vector.extract_strided_slice %62 {offsets = [2, 0, 0], sizes = [2, 8, 8], strides = [1, 1, 1]} : vector<8x8x8xf32> to vector<2x8x8xf32>
    %70 = vector.shape_cast %69 : vector<2x8x8xf32> to vector<16x8xf32>
    %71 = arith.truncf %70 : vector<16x8xf32> to vector<16x8xbf16>
    %c0_20 = arith.constant 0 : index
    %c1 = arith.constant 1 : index
    %c0_21 = arith.constant 0 : index
    %c0_22 = arith.constant 0 : index
    %72 = vector.load %arg5[%c0_20, %c1, %c0_21, %c0_22] : memref<1x4x8x32xbf16, #tpu.memory_space<vmem>>, vector<1x1x8x32xbf16>
    %73 = vector.shape_cast %72 : vector<1x1x8x32xbf16> to vector<8x32xbf16>
    %cst_23 = arith.constant dense<0.000000e+00> : vector<16x32xf32>
    %74 = tpu.matmul %71, %73, %cst_23 {dimension_numbers = #tpu.dot_dimension_numbers<[1], [0], [0], [1], [0, 0, 1, 1], [], []>} : vector<16x8xbf16>, vector<8x32xbf16>, vector<16x32xf32> -> vector<16x32xf32>
    %75 = arith.addf %68, %74 : vector<16x32xf32>
    %76 = vector.extract_strided_slice %62 {offsets = [4, 0, 0], sizes = [2, 8, 8], strides = [1, 1, 1]} : vector<8x8x8xf32> to vector<2x8x8xf32>
    %77 = vector.shape_cast %76 : vector<2x8x8xf32> to vector<16x8xf32>
    %78 = arith.truncf %77 : vector<16x8xf32> to vector<16x8xbf16>
    %c0_24 = arith.constant 0 : index
    %c2 = arith.constant 2 : index
    %c0_25 = arith.constant 0 : index
    %c0_26 = arith.constant 0 : index
    %79 = vector.load %arg5[%c0_24, %c2, %c0_25, %c0_26] : memref<1x4x8x32xbf16, #tpu.memory_space<vmem>>, vector<1x1x8x32xbf16>
    %80 = vector.shape_cast %79 : vector<1x1x8x32xbf16> to vector<8x32xbf16>
    %cst_27 = arith.constant dense<0.000000e+00> : vector<16x32xf32>
    %81 = tpu.matmul %78, %80, %cst_27 {dimension_numbers = #tpu.dot_dimension_numbers<[1], [0], [0], [1], [0, 0, 1, 1], [], []>} : vector<16x8xbf16>, vector<8x32xbf16>, vector<16x32xf32> -> vector<16x32xf32>
    %82 = arith.addf %75, %81 : vector<16x32xf32>
    %83 = vector.extract_strided_slice %62 {offsets = [6, 0, 0], sizes = [2, 8, 8], strides = [1, 1, 1]} : vector<8x8x8xf32> to vector<2x8x8xf32>
    %84 = vector.shape_cast %83 : vector<2x8x8xf32> to vector<16x8xf32>
    %85 = arith.truncf %84 : vector<16x8xf32> to vector<16x8xbf16>
    %c0_28 = arith.constant 0 : index
    %c3 = arith.constant 3 : index
    %c0_29 = arith.constant 0 : index
    %c0_30 = arith.constant 0 : index
    %86 = vector.load %arg5[%c0_28, %c3, %c0_29, %c0_30] : memref<1x4x8x32xbf16, #tpu.memory_space<vmem>>, vector<1x1x8x32xbf16>
    %87 = vector.shape_cast %86 : vector<1x1x8x32xbf16> to vector<8x32xbf16>
    %cst_31 = arith.constant dense<0.000000e+00> : vector<16x32xf32>
    %88 = tpu.matmul %85, %87, %cst_31 {dimension_numbers = #tpu.dot_dimension_numbers<[1], [0], [0], [1], [0, 0, 1, 1], [], []>} : vector<16x8xbf16>, vector<8x32xbf16>, vector<16x32xf32> -> vector<16x32xf32>
    %89 = arith.addf %82, %88 : vector<16x32xf32>
    %c0_32 = arith.constant 0 : index
    %c0_33 = arith.constant 0 : index
    %c0_34 = arith.constant 0 : index
    %90 = vector.load %arg6[%c0_32, %c0_33, %c0_34] : memref<1x1x32xf32, #tpu.memory_space<vmem>>, vector<1x1x32xf32>
    %91 = vector.shape_cast %90 : vector<1x1x32xf32> to vector<1x32xf32>
    %92 = vector.broadcast %91 : vector<1x32xf32> to vector<16x32xf32>
    %93 = arith.addf %89, %92 : vector<16x32xf32>
    %94 = arith.addf %3, %93 : vector<16x32xf32>
    %c0_35 = arith.constant 0 : index
    %c0_36 = arith.constant 0 : index
    %c0_37 = arith.constant 0 : index
    %95 = vector.load %arg7[%c0_35, %c0_36, %c0_37] : memref<1x1x32xf32, #tpu.memory_space<vmem>>, vector<1x1x32xf32>
    %96 = vector.shape_cast %95 : vector<1x1x32xf32> to vector<1x32xf32>
    %c0_38 = arith.constant 0 : index
    %c0_39 = arith.constant 0 : index
    %c0_40 = arith.constant 0 : index
    %97 = vector.load %arg8[%c0_38, %c0_39, %c0_40] : memref<1x1x32xf32, #tpu.memory_space<vmem>>, vector<1x1x32xf32>
    %98 = vector.shape_cast %97 : vector<1x1x32xf32> to vector<1x32xf32>
    %cst_41 = arith.constant dense<0.000000e+00> : vector<16xf32>
    %99 = vector.multi_reduction <add>, %94, %cst_41 [1] : vector<16x32xf32> to vector<16xf32>
    %100 = vector.shape_cast %99 : vector<16xf32> to vector<16x1xf32>
    %cst_42 = arith.constant 3.200000e+01 : f32
    %101 = vector.broadcast %cst_42 : f32 to vector<16x1xf32>
    %102 = arith.divf %100, %101 : vector<16x1xf32>
    %103 = vector.broadcast %102 : vector<16x1xf32> to vector<16x32xf32>
    %104 = arith.subf %94, %103 : vector<16x32xf32>
    %105 = arith.mulf %104, %104 : vector<16x32xf32>
    %cst_43 = arith.constant dense<0.000000e+00> : vector<16xf32>
    %106 = vector.multi_reduction <add>, %105, %cst_43 [1] : vector<16x32xf32> to vector<16xf32>
    %107 = vector.shape_cast %106 : vector<16xf32> to vector<16x1xf32>
    %cst_44 = arith.constant 3.200000e+01 : f32
    %108 = vector.broadcast %cst_44 : f32 to vector<16x1xf32>
    %109 = arith.divf %107, %108 : vector<16x1xf32>
    %110 = vector.broadcast %102 : vector<16x1xf32> to vector<16x32xf32>
    %111 = arith.subf %94, %110 : vector<16x32xf32>
    %cst_45 = arith.constant 9.99999996E-13 : f32
    %112 = vector.broadcast %cst_45 : f32 to vector<16x1xf32>
    %113 = arith.addf %109, %112 : vector<16x1xf32>
    %114 = math.rsqrt %113 : vector<16x1xf32>
    %115 = vector.broadcast %114 : vector<16x1xf32> to vector<16x32xf32>
    %116 = arith.mulf %111, %115 : vector<16x32xf32>
    %117 = vector.broadcast %96 : vector<1x32xf32> to vector<16x32xf32>
    %118 = arith.mulf %116, %117 : vector<16x32xf32>
    %119 = vector.broadcast %98 : vector<1x32xf32> to vector<16x32xf32>
    %120 = arith.addf %118, %119 : vector<16x32xf32>
    %121 = arith.truncf %120 : vector<16x32xf32> to vector<16x32xbf16>
    %c0_46 = arith.constant 0 : index
    %c0_47 = arith.constant 0 : index
    %c0_48 = arith.constant 0 : index
    %122 = vector.load %arg9[%c0_46, %c0_47, %c0_48] : memref<1x32x64xbf16, #tpu.memory_space<vmem>>, vector<1x32x64xbf16>
    %123 = vector.shape_cast %122 : vector<1x32x64xbf16> to vector<32x64xbf16>
    %cst_49 = arith.constant dense<0.000000e+00> : vector<16x64xf32>
    %124 = tpu.matmul %121, %123, %cst_49 {dimension_numbers = #tpu.dot_dimension_numbers<[1], [0], [0], [1], [0, 0, 1, 1], [], []>} : vector<16x32xbf16>, vector<32x64xbf16>, vector<16x64xf32> -> vector<16x64xf32>
    %c0_50 = arith.constant 0 : index
    %c0_51 = arith.constant 0 : index
    %c0_52 = arith.constant 0 : index
    %125 = vector.load %arg10[%c0_50, %c0_51, %c0_52] : memref<1x1x64xf32, #tpu.memory_space<vmem>>, vector<1x1x64xf32>
    %126 = vector.shape_cast %125 : vector<1x1x64xf32> to vector<1x64xf32>
    %127 = vector.broadcast %126 : vector<1x64xf32> to vector<16x64xf32>
    %128 = arith.addf %124, %127 : vector<16x64xf32>
    %cst_53 = arith.constant 5.000000e-01 : f32
    %129 = vector.broadcast %cst_53 : f32 to vector<16x64xf32>
    %130 = arith.mulf %129, %128 : vector<16x64xf32>
    %cst_54 = arith.constant 0.707106769 : f32
    %131 = vector.broadcast %cst_54 : f32 to vector<16x64xf32>
    %132 = arith.mulf %128, %131 : vector<16x64xf32>
    %133 = math.erf %132 : vector<16x64xf32>
    %cst_55 = arith.constant 1.000000e+00 : f32
    %134 = vector.broadcast %cst_55 : f32 to vector<16x64xf32>
    %135 = arith.addf %134, %133 : vector<16x64xf32>
    %136 = arith.mulf %130, %135 : vector<16x64xf32>
    %137 = arith.truncf %136 : vector<16x64xf32> to vector<16x64xbf16>
    %c0_56 = arith.constant 0 : index
    %c0_57 = arith.constant 0 : index
    %c0_58 = arith.constant 0 : index
    %138 = vector.load %arg11[%c0_56, %c0_57, %c0_58] : memref<1x64x32xbf16, #tpu.memory_space<vmem>>, vector<1x64x32xbf16>
    %139 = vector.shape_cast %138 : vector<1x64x32xbf16> to vector<64x32xbf16>
    %cst_59 = arith.constant dense<0.000000e+00> : vector<16x32xf32>
    %140 = tpu.matmul %137, %139, %cst_59 {dimension_numbers = #tpu.dot_dimension_numbers<[1], [0], [0], [1], [0, 0, 1, 1], [], []>} : vector<16x64xbf16>, vector<64x32xbf16>, vector<16x32xf32> -> vector<16x32xf32>
    %c0_60 = arith.constant 0 : index
    %c0_61 = arith.constant 0 : index
    %c0_62 = arith.constant 0 : index
    %141 = vector.load %arg12[%c0_60, %c0_61, %c0_62] : memref<1x1x32xf32, #tpu.memory_space<vmem>>, vector<1x1x32xf32>
    %142 = vector.shape_cast %141 : vector<1x1x32xf32> to vector<1x32xf32>
    %143 = vector.broadcast %142 : vector<1x32xf32> to vector<16x32xf32>
    %144 = arith.addf %140, %143 : vector<16x32xf32>
    %145 = arith.addf %120, %144 : vector<16x32xf32>
    %c0_63 = arith.constant 0 : index
    %c0_64 = arith.constant 0 : index
    %c0_65 = arith.constant 0 : index
    %146 = vector.load %arg13[%c0_63, %c0_64, %c0_65] : memref<1x1x32xf32, #tpu.memory_space<vmem>>, vector<1x1x32xf32>
    %147 = vector.shape_cast %146 : vector<1x1x32xf32> to vector<1x32xf32>
    %c0_66 = arith.constant 0 : index
    %c0_67 = arith.constant 0 : index
    %c0_68 = arith.constant 0 : index
    %148 = vector.load %arg14[%c0_66, %c0_67, %c0_68] : memref<1x1x32xf32, #tpu.memory_space<vmem>>, vector<1x1x32xf32>
    %149 = vector.shape_cast %148 : vector<1x1x32xf32> to vector<1x32xf32>
    %cst_69 = arith.constant dense<0.000000e+00> : vector<16xf32>
    %150 = vector.multi_reduction <add>, %145, %cst_69 [1] : vector<16x32xf32> to vector<16xf32>
    %151 = vector.shape_cast %150 : vector<16xf32> to vector<16x1xf32>
    %cst_70 = arith.constant 3.200000e+01 : f32
    %152 = vector.broadcast %cst_70 : f32 to vector<16x1xf32>
    %153 = arith.divf %151, %152 : vector<16x1xf32>
    %154 = vector.broadcast %153 : vector<16x1xf32> to vector<16x32xf32>
    %155 = arith.subf %145, %154 : vector<16x32xf32>
    %156 = arith.mulf %155, %155 : vector<16x32xf32>
    %cst_71 = arith.constant dense<0.000000e+00> : vector<16xf32>
    %157 = vector.multi_reduction <add>, %156, %cst_71 [1] : vector<16x32xf32> to vector<16xf32>
    %158 = vector.shape_cast %157 : vector<16xf32> to vector<16x1xf32>
    %cst_72 = arith.constant 3.200000e+01 : f32
    %159 = vector.broadcast %cst_72 : f32 to vector<16x1xf32>
    %160 = arith.divf %158, %159 : vector<16x1xf32>
    %161 = vector.broadcast %153 : vector<16x1xf32> to vector<16x32xf32>
    %162 = arith.subf %145, %161 : vector<16x32xf32>
    %cst_73 = arith.constant 9.99999996E-13 : f32
    %163 = vector.broadcast %cst_73 : f32 to vector<16x1xf32>
    %164 = arith.addf %160, %163 : vector<16x1xf32>
    %165 = math.rsqrt %164 : vector<16x1xf32>
    %166 = vector.broadcast %165 : vector<16x1xf32> to vector<16x32xf32>
    %167 = arith.mulf %162, %166 : vector<16x32xf32>
    %168 = vector.broadcast %147 : vector<1x32xf32> to vector<16x32xf32>
    %169 = arith.mulf %167, %168 : vector<16x32xf32>
    %170 = vector.broadcast %149 : vector<1x32xf32> to vector<16x32xf32>
    %171 = arith.addf %169, %170 : vector<16x32xf32>
    %c0_74 = arith.constant 0 : index
    %c0_75 = arith.constant 0 : index
    %172 = vector.load %arg17[%c0_74, %c0_75] : memref<16x32xf32, #tpu.memory_space<vmem>>, vector<16x32xf32>
    tpu.vector_store %arg17[%c0_74, %c0_75], %171 {strides = array<i32>} : memref<16x32xf32, #tpu.memory_space<vmem>>, vector<16x32xf32>,
    %173 = vector.shape_cast %171 : vector<16x32xf32> to vector<2x8x32xf32>
    %c0_76 = arith.constant 0 : index
    %c0_77 = arith.constant 0 : index
    %c0_78 = arith.constant 0 : index
    %c0_79 = arith.constant 0 : index
    %174 = vector.load %arg15[%c0_76, %c0_77, %c0_78, %c0_79] : memref<1x2x8x32xf32, #tpu.memory_space<vmem>>, vector<1x2x8x32xf32>
    %175 = vector.shape_cast %174 : vector<1x2x8x32xf32> to vector<2x8x32xf32>
    %176 = vector.shape_cast %173 : vector<2x8x32xf32> to vector<1x2x8x32xf32>
    tpu.vector_store %arg15[%c0_76, %c0_77, %c0_78, %c0_79], %176 {strides = array<i32>} : memref<1x2x8x32xf32, #tpu.memory_space<vmem>>, vector<1x2x8x32xf32>,
    %c0_80 = arith.constant 0 : index
    %c0_81 = arith.constant 0 : index
    %c0_82 = arith.constant 0 : index
    %c0_83 = arith.constant 0 : index
    %177 = vector.load %arg16[%c0_80, %c0_81, %c0_82, %c0_83] : memref<1x2x8x8xf32, #tpu.memory_space<vmem>>, vector<1x2x8x8xf32>
    %178 = vector.shape_cast %177 : vector<1x2x8x8xf32> to vector<2x8x8xf32>
    %179 = vector.shape_cast %60 : vector<2x8x8xf32> to vector<1x2x8x8xf32>
    tpu.vector_store %arg16[%c0_80, %c0_81, %c0_82, %c0_83], %179 {strides = array<i32>} : memref<1x2x8x8xf32, #tpu.memory_space<vmem>>, vector<1x2x8x8xf32>,
    return
  }
  func.func @transform_0(%arg0: i32, %arg1: i32) -> (i32, i32, i32) {
    %c0_i32 = arith.constant 0 : i32
    %c0_i32_0 = arith.constant 0 : i32
    %c0_i32_1 = arith.constant 0 : i32
    return %arg0, %c0_i32, %c0_i32_0 : i32, i32, i32
  }
  func.func @transform_1(%arg0: i32, %arg1: i32) -> (i32, i32, i32) {
    %c0_i32 = arith.constant 0 : i32
    %c0_i32_0 = arith.constant 0 : i32
    %c0_i32_1 = arith.constant 0 : i32
    return %arg1, %c0_i32, %c0_i32_0 : i32, i32, i32
  }
  func.func @transform_2(%arg0: i32, %arg1: i32) -> (i32, i32, i32) {
    %c0_i32 = arith.constant 0 : i32
    %c0_i32_0 = arith.constant 0 : i32
    %c0_i32_1 = arith.constant 0 : i32
    return %arg1, %c0_i32, %c0_i32_0 : i32, i32, i32
  }
  func.func @transform_3(%arg0: i32, %arg1: i32) -> (i32, i32, i32, i32) {
    %c0_i32 = arith.constant 0 : i32
    %c0_i32_0 = arith.constant 0 : i32
    %c0_i32_1 = arith.constant 0 : i32
    %c0_i32_2 = arith.constant 0 : i32
    return %arg1, %c0_i32, %c0_i32_0, %c0_i32_1 : i32, i32, i32, i32
  }
  func.func @transform_4(%arg0: i32, %arg1: i32) -> (i32, i32, i32) {
    %c0_i32 = arith.constant 0 : i32
    %c0_i32_0 = arith.constant 0 : i32
    %c0_i32_1 = arith.constant 0 : i32
    return %arg1, %c0_i32, %c0_i32_0 : i32, i32, i32
  }
  func.func @transform_5(%arg0: i32, %arg1: i32) -> (i32, i32, i32) {
    %c0_i32 = arith.constant 0 : i32
    %c0_i32_0 = arith.constant 0 : i32
    %c0_i32_1 = arith.constant 0 : i32
    return %arg1, %c0_i32, %c0_i32_0 : i32, i32, i32
  }
  func.func @transform_6(%arg0: i32, %arg1: i32) -> (i32, i32, i32) {
    %c0_i32 = arith.constant 0 : i32
    %c0_i32_0 = arith.constant 0 : i32
    %c0_i32_1 = arith.constant 0 : i32
    return %arg1, %c0_i32, %c0_i32_0 : i32, i32, i32
  }
  func.func @transform_7(%arg0: i32, %arg1: i32) -> (i32, i32, i32) {
    %c0_i32 = arith.constant 0 : i32
    %c0_i32_0 = arith.constant 0 : i32
    %c0_i32_1 = arith.constant 0 : i32
    return %arg1, %c0_i32, %c0_i32_0 : i32, i32, i32
  }
  func.func @transform_8(%arg0: i32, %arg1: i32) -> (i32, i32, i32) {
    %c0_i32 = arith.constant 0 : i32
    %c0_i32_0 = arith.constant 0 : i32
    %c0_i32_1 = arith.constant 0 : i32
    return %arg1, %c0_i32, %c0_i32_0 : i32, i32, i32
  }
  func.func @transform_9(%arg0: i32, %arg1: i32) -> (i32, i32, i32) {
    %c0_i32 = arith.constant 0 : i32
    %c0_i32_0 = arith.constant 0 : i32
    %c0_i32_1 = arith.constant 0 : i32
    return %arg1, %c0_i32, %c0_i32_0 : i32, i32, i32
  }
  func.func @transform_10(%arg0: i32, %arg1: i32) -> (i32, i32, i32) {
    %c0_i32 = arith.constant 0 : i32
    %c0_i32_0 = arith.constant 0 : i32
    %c0_i32_1 = arith.constant 0 : i32
    return %arg1, %c0_i32, %c0_i32_0 : i32, i32, i32
  }
  func.func @transform_11(%arg0: i32, %arg1: i32) -> (i32, i32, i32) {
    %c0_i32 = arith.constant 0 : i32
    %c0_i32_0 = arith.constant 0 : i32
    %c0_i32_1 = arith.constant 0 : i32
    return %arg1, %c0_i32, %c0_i32_0 : i32, i32, i32
  }
  func.func @transform_12(%arg0: i32, %arg1: i32) -> (i32, i32, i32) {
    %c0_i32 = arith.constant 0 : i32
    %c0_i32_0 = arith.constant 0 : i32
    %c0_i32_1 = arith.constant 0 : i32
    return %arg1, %c0_i32, %c0_i32_0 : i32, i32, i32
  }
  func.func @transform_13(%arg0: i32, %arg1: i32) -> (i32, i32, i32, i32) {
    %c0_i32 = arith.constant 0 : i32
    %c0_i32_0 = arith.constant 0 : i32
    %c0_i32_1 = arith.constant 0 : i32
    return %arg1, %arg0, %c0_i32, %c0_i32_0 : i32, i32, i32, i32
  }
  func.func @transform_14(%arg0: i32, %arg1: i32) -> (i32, i32, i32, i32) {
    %c0_i32 = arith.constant 0 : i32
    %c0_i32_0 = arith.constant 0 : i32
    %c0_i32_1 = arith.constant 0 : i32
    return %arg1, %arg0, %c0_i32, %c0_i32_0 : i32, i32, i32, i32
  }
}

</mosaic_0001>

<bundles_post_ra>
// kernel: tpu_custom_call.1
= control target key start
LH: loop header
LB: loop body
LE: loop exit
PB: predicated region body
PF: predicated region fallthrough
CT: control target
= control target key end

     0   :  { %s3620_s0 = inlined_call_operand.hbm [shape: f32[2,8,32], index: 0, kind: input, shape index: {}]   ;;  %s3621_s1 = inlined_call_operand.vmem [shape: bf16[2,32,96], index: 1, kind: input, shape index: {}]   ;;  %s3622_s2 = inlined_call_operand.vmem [shape: f32[2,1,96], index: 2, kind: input, shape index: {}]   ;;  %s3623_s3 = inlined_call_operand.vmem [shape: bf16[2,4,8,32], index: 3, kind: input, shape index: {}]   ;;  %s3624_s4 = inlined_call_operand.vmem [shape: f32[2,1,32], index: 4, kind: input, shape index: {}]   ;;  %s3625_s5 = inlined_call_operand.vmem [shape: f32[2,1,32], index: 5, kind: input, shape index: {}]   ;;  %s3626_s6 = inlined_call_operand.vmem [shape: f32[2,1,32], index: 6, kind: input, shape index: {}]   ;;  %s3627_s7 = inlined_call_operand.vmem [shape: bf16[2,32,64], index: 7, kind: input, shape index: {}]   ;;  %s3628_s8 = inlined_call_operand.vmem [shape: f32[2,1,64], index: 8, kind: input, shape index: {}]   ;;  %s3629_s9 = inlined_call_operand.vmem [shape: bf16[2,64,32], index: 9, kind: input, shape index: {}]   ;;  %s3630_s10 = inlined_call_operand.vmem [shape: f32[2,1,32], index: 10, kind: input, shape index: {}]   ;;  %s3631_s11 = inlined_call_operand.vmem [shape: f32[2,1,32], index: 11, kind: input, shape index: {}]   ;;  %s3632_s12 = inlined_call_operand.vmem [shape: f32[2,1,32], index: 12, kind: input, shape index: {}]   ;;  %s3633_s13 = inlined_call_operand.hbm [shape: f32[2,2,8,32], index: 13, kind: output, shape index: {0}]   ;;  %s3634_s14 = inlined_call_operand.hbm [shape: f32[2,2,8,8], index: 14, kind: output, shape index: {1}]  }
   0x1   :  { %3651 = sst [smem:[#allocation23_spill]] %s3620_s0 }
   0x2   :  { %3652 = sst [smem:[#allocation24_spill]] %s3621_s1 }
   0x3   :  { %3653 = sst [smem:[#allocation25_spill]] %s3623_s3 }
   0x4   :  { %3654 = sst [smem:[#allocation26_spill]] %s3633_s13 }
   0x5   :  { %3655 = sst [smem:[#allocation27_spill]] %s3634_s14 }
   0x6   :  { %20 = vsyncpa [#allocation4], 0 }
   0x7   :  { %21 = vsyncpa [#allocation5], 0 }
   0x8   :  { %23 = vsyncpa [#allocation5 + $0x1], 0 }
   0x9   :  { %24 = vsyncpa [#allocation8], 0 }
   0xa   :  { %26 = vsyncpa [#allocation8 + $0x1], 0  ;;  %s3091_s29 = smov 0   ;;  %s3093_s30 = smov 0  }
   0xb   :  { %s3095_s15 = smov 0   ;;  %s3097_s16 = smov 0  }
   0xc   :  { %s3099_s17 = smov 0   ;;  %s3101_s18 = smov 0  }
   0xd LB: > { %3656 = sst [smem:[#allocation12_spill]] %s2980_s29  ;;  %s2442_s19 = sadd.s32 4294967295, %s3000_s18   ;;  %s3000_s18 = sphi %s3101_s18, %s32_s18   ;;  %s2996_s17 = sphi %s3099_s17, %s3693_s17   ;;  %s2992_s16 = sphi %s3097_s16, %s3692_s16   ;;  %s2988_s15 = sphi %s3095_s15, %s3691_s15   ;;  %s2984_s30 = sphi %s3093_s30, %s3690_s30   ;;  %s2980_s29 = sphi %s3091_s29, %s3689_s29  }
   0xe   : > { %3657 = sst [smem:[#allocation13_spill]] %s2984_s30  ;;  %s2443_s20 = sadd.s32 4294967294, %s3000_s18  }
   0xf   : > { %3658 = sst [smem:[#allocation14_spill]] %s2988_s15  ;;  %s41_s21 = sadd.s32 1, %s2996_s17 }
  0x10   : > { %3659 = sst [smem:[#allocation15_spill]] %s2992_s16  ;;  %s391_s22 = sadd.s32 1, %s2988_s15 }
  0x11   : > { %3660 = sst [smem:[#allocation16_spill]] %s2996_s17  ;;  %p42_p0 = scmp.ge.s32.totalorder %s41_s21, 2 }
  0x12   : > { %3661 = sst [smem:[#allocation17_spill]] %s3000_s18  ;;  %p401_p1 = scmp.ne.s32.totalorder %s2988_s15, %s2984_s30 }
  0x13   : > { %p402_p2 = scmp.eq.s32.totalorder %s2442_s19, 1  ;;  %p407_p3 = scmp.ne.s32.totalorder %s2984_s30, %s2980_s29 }
  0x14   : > { %s3695_s21 = smov (%p42_p0, %s41_s21), 0  ;;  %p408_p5 = scmp.eq.s32.totalorder %s2443_s20, 1 }
  0x15   : > { %3662 = sst [smem:[#allocation18_spill]] %s3695_s21  ;;  %p3131_p4 = por %p402_p2, %p401_p1 }
  0x16   : > { %s386_s24 = ssub.s32 %s2996_s17, %s3695_s21  ;;  %p2444_p6 = scmp.ge.s32.totalorder %s3000_s18, 1 }
  0x17   : > { %s3663_s23 = scalar_select %p3131_p4, 1, 0 }
  0x18   : > { %p389_p7 = scmp.eq.s32.totalorder %s386_s24, 0  ;;  %p3138_p8 = por %p408_p5, %p407_p3 }
  0x19   : > { %3664 = sst [smem:[#allocation19_spill]] %s3663_s23  ;;  %p443_p9 = scmp.lt.s32.totalorder %s3000_s18, 3 }
  0x1a   : > { %s3665_s25 = scalar_select %p3138_p8, 1, 0 }
  0x1b   : > { %s3144_s26 = scalar_select %p389_p7, %s2988_s15, %s391_s22  }
  0x1c   : > { %3666 = sst [smem:[#allocation20_spill]] %s3665_s25  ;;  %p3146_p10 = pnand %p2444_p6, %p443_p9 }
  0x1d   : > { %3667 = sst [smem:[#allocation21_spill]] %s3144_s26  ;;  %p3150_p11 = scmp.eq.s32.totalorder %s2442_s19, 0 }
  0x1e   : > { %p2723_p12 = pneg %p3146_p10  ;;  %s3002_s20 = smov [#allocation3]  }
  0x1f   : > { %s458_s24 = sshll.u32 %s3002_s20, 4  ;;  %s459_s24 = int_to_ptr.vmem [resolvable:$true] %s458_s24 }
  0x20   : > { %p2724_p13 = pnand %p3150_p11, %p2723_p12  ;;  %s2875_s22 = scalar_lea.vmem %s459_s24, 256 }
  0x21   : > { %p2876_p1 = scmp.ne.s32.totalorder %s459_s24, %s2875_s22  ;;  %p2883_p5 = scmp.lt.s32.totalorder %s459_s24, %s459_s24 }
  0x22   : > { %p2866_p0 = pneg %p2724_p13  ;;  %p2884_p6 = scmp.lt.s32.totalorder %s2875_s22, %s2875_s22 }
  0x24   : > { %p2878_p2 = pnand %p2876_p1, %p2866_p0  ;;  %p2885_p7 = por %p2884_p6, %p2883_p5 }
  0x26   : > { %p2879_p3 = pneg %p2878_p2 }
  0x28   : > { %p2886_p9 = pnand %p2885_p7, %p2879_p3 }
  0x2a   : > { %2889 = shalt.err (!%p2886_p9)
}
  0x2b   : > { %s3003_s19 = smov 128   ;;  %s3004_s21 = smov 8  }
  0x2c   : > { %s3670_s0 = sld [smem:[#allocation23_spill]] }
  0x2e   : > { %554 = sbr.rel (%p3146_p10) target bundleno = 2548 (0x9f4), region = 72 }
  0x32   : > { %2726 = dma.hbm_to_vmem [thread:$0]  (!%p2724_p13), %s3670_s0, 256, %s459_s24, [#allocation4], %s3003_s19, %s3003_s19, %s3004_s21  }
  0x33   : > { %2967 = dma.done.wait (%p3150_p11), [#allocation4], 256  }
  0x34   : > { %2969 = vsyncadd (%p3150_p11), [#allocation4], 4294967040  ;;  %s3168_s20 = sand.u32 1, %s2984_s30   ;;  %p645_p12 = scmp.lt.s32.totalorder %s2992_s16, 1 }
  0x35   : > { %3671 = sst [smem:[#allocation22_spill]] %s3168_s20  ;;  %s2449_s22 = sshll.u32 %s3168_s20, 4 }
  0x36   : > { %s3173_s15 = scalar_select %p645_p12, %s2992_s16, 1 }
  0x37   : > { %s3672_s1 = sld [smem:[#allocation24_spill]]  ;;  %s3227_s0 = scalar_lea.vmem [#allocation6], %s2449_s22 }
  0x38   : > { %s2510_s17 = sshll.u32 %s3173_s15, 4  ;;  %s3673_s3 = sld [smem:[#allocation25_spill]] }
  0x39   : > { %s3203_s24 = scalar_lea.vmem %s3627_s7, %s2510_s17  ;;  %s682_s16 = scalar_lea.vmem %s3630_s10, %s3173_s15 }
  0x3a   : > { %s685_s27 = scalar_lea.vmem %s3631_s11, %s3173_s15  ;;  %s688_s20 = scalar_lea.vmem %s3632_s12, %s3173_s15 }
  0x3b   : > { %s3229_s30 = scalar_lea.vmem [#allocation7], %s2449_s22 }
  0x3d   : > { %s649_s19 = scalar_lea.vmem %s3672_s1, %s2510_s17  ;;  %s3674_s1 = sld [smem:[#allocation15_spill]] }
  0x3e   : > { %s3186_s25 = scalar_lea.vmem %s3673_s3, %s2510_s17  ;;  %s2513_s3 = sshll.u32 %s3173_s15, 5 }
  0x3f   : > { %s3213_s13 = scalar_lea.vmem %s3629_s9, %s2513_s3 }
  0x43   : > { %p2459_p10 = scmp.ne.s32.totalorder %s3674_s1, 0 }
  0x45   : > { %695 = sbr.rel (%p2459_p10) target bundleno = 76 (0x4c), region = 80 }
  0x4a   : > { %v696_v0 = vld [vmem:[#allocation3] sm:$0xff]  ;;  %vm698_vm0 = vcmask 261120   ;;  %v697_v1 = vld [vmem:[#allocation3 + $0x8] sm:$0xff] }
  0x4b   : > { %699 = vst.msk [vmem:[#allocation2] sm:$0xff] %vm698_vm0, %v696_v0  ;;  %700 = vst.msk [vmem:[#allocation2 + $0x8] sm:$0xff] %vm698_vm0, %v697_v1 }
  0x4c PF: > { %v2812_v2 = vld [vmem:[%s649_s19 + $0x8] sm:$0xff]   ;;  %v3005_v3 = vmov 0.0   ;;  %v2813_v4 = vld [vmem:[%s649_s19] sm:$0xff]   ;;  %vm3006_vm1 = vmmov 0   ;;  %vm727_vm2 = vcmask 261120   ;;  %s3675_s22 = scalar_lea.vmem %s3622_s2, %s3173_s15  ;;  %s3007_s19 = smov 104  }
  0x4d   : > { %2567 = vmatprep.subr.bf16.mxu1 %v3005_v3  ;;  %2581 = vmatprep.subr.bf16.mxu0 %v3005_v3  ;;  %v2460_v9 = vld [vmem:[%s3675_s22] ss:$0 sm:$0xff]  ;;  %s3008_s26 = smov 120   ;;  %s3009_s29 = smov 96   ;;  %vm803_vm3 = vcmask 64512   ;;  %vm1319_vm4 = vcmask 1043456  }
  0x4e   : > { %2568 = vmatpush3.bf16.msra.mxu1 %v2812_v2  ;;  %2571 = vmatprep.mubr.msk.bf16.mxu1 %vm3006_vm1, %v3005_v3  ;;  %s3010_s18 = smov 112   ;;  %s3011_s14 = smov 64   ;;  %vm2076_vm5 = vcmask 523264  }
  0x4f   : > { %2569 = vmatprep.subr.bf16.mxu1 %v3005_v3  ;;  %2583 = vmatprep.mubr.msk.bf16.mxu0 %vm3006_vm1, %v3005_v3  ;;  %s3676_s21 = scalar_lea.vmem %s3624_s4, %s3173_s15  ;;  %s3678_s22 = scalar_lea.vmem %s3626_s6, %s3173_s15 }
  0x50   : > { %s3683_s28 = sld [smem:[#allocation27_spill]]  ;;  %s2212_s1 = sshll.u32 %s3229_s30, 4  ;;  %s3520_s1 = int_to_ptr.vmem [resolvable:$true] %s2212_s1 }
  0x52   : > { %v3236_v5 = vld [vmem:[#allocation2] sm:$0xff]  ;;  %v3238_v6 = vld [vmem:[#allocation2 + $0x8] sm:$0xff]  ;;  %2570 = vmatpush3.bf16.msra.mxu1 %v2813_v4 }
  0x53   : > { %v703_v7 = vpack.c.bf16 %v3238_v6, %v3236_v5  ;;  %2575 = vmatprep.subr.bf16.mxu1 %v3005_v3 }
  0x55   : > { %2572 = vmatmul.mubr.msk.bf16.vlgmr.msra.gmra.mxu1 %vm727_vm2, %v703_v7 }
  0x56   : > { %2577 = vmatprep.mubr.msk.bf16.mxu1 %vm3006_vm1, %v3005_v3 }
 0x115   : > { %v765_v8 = vpop.f32.mrf.mxu1 }
 0x116   : > { %v766_v12 = vadd.f32 %v2460_v9, %v765_v8 }
 0x117   : > { %v2573_v10 = vpop.f32.mrf.mxu1 }
 0x118   : > { %v792_v16 = vpack.c.bf16 %v766_v12, %v766_v12 }
 0x119   : > { %v768_v11 = vpop.f32.mrf.mxu1 }
 0x11a   : > { %v769_v13 = vadd.f32 %v2460_v9, %v768_v11 }
 0x11b   : > { %v2574_v14 = vpop.f32.mrf.mxu1 }
 0x11c   : > { %v2807_v15 = vpack.i.bf16 %v769_v13, %v766_v12  ;;  %v793_v17 = vpack.c.bf16 %v769_v13, %v769_v13 }
 0x11e   : > { %2808 = vrot.lane.b32.xlu1 %v2807_v15, %s3007_s19  ;;  %2798 = vrot.lane.b32.xlu0 %v2807_v15, %s3008_s26  ;;  %s3012_s19 = smov [#allocation7]  }
 0x11f   : > { %s2894_s26 = sshll.u32 %s3012_s19, 4  ;;  %s2895_s26 = int_to_ptr.vmem [resolvable:$false] %s2894_s26 }
 0x120   : > { %p2897_p1 = scmp.lt.s32.totalorder %s3520_s1, %s2895_s26 }
 0x122   : > { %801 = vrot.lane.b32.xlu1 %v792_v16, %s3009_s29  ;;  %2803 = vrot.lane.b32.xlu0 %v2807_v15, %s3010_s18 }
 0x126   : > { %851 = vrot.lane.b32.xlu0 %v793_v17, %s3009_s29 }
 0x190   : > { %v2809_v18 = vpop.permute.xlu1 %2808  ;;  %v2799_v19 = vpop.permute.xlu0 %2798 }
 0x191   : > { %v2801_v20 = vunpack.i.h.bf16 %v2799_v19  ;;  %v2800_v21 = vunpack.i.l.bf16 %v2799_v19  ;;  %v2810_v29 = vunpack.i.l.bf16 %v2809_v18  ;;  %v2811_v32 = vunpack.i.h.bf16 %v2809_v18 }
 0x193   : > { %v3256_v22 = vpack.c.bf16 %v2801_v20, %v2801_v20  ;;  %v3258_v23 = vpack.c.bf16 %v2800_v21, %v2800_v21  ;;  %v3275_v35 = vpack.c.bf16 %v2810_v29, %v2810_v29  ;;  %v3278_v36 = vpack.c.bf16 %v2811_v32, %v2811_v32 }
 0x194   : > { %v802_v24 = vpop.permute.xlu1 %801  ;;  %v2804_v25 = vpop.permute.xlu0 %2803 }
 0x195   : > { %v808_v26 = vsel %vm803_vm3, %v802_v24, 0  ;;  %v2806_v27 = vunpack.i.h.bf16 %v2804_v25  ;;  %v2805_v28 = vunpack.i.l.bf16 %v2804_v25  ;;  %900 = vrot.lane.b32.xlu1 %v3258_v23, %s3009_s29  ;;  %949 = vrot.lane.b32.xlu0 %v3256_v22, %s3009_s29 }
 0x196   : > { %2576 = vmatpush3.bf16.xpose.msra.mxu1 %v808_v26 }
 0x197   : > { %v3265_v30 = vpack.c.bf16 %v2806_v27, %v2806_v27  ;;  %v3267_v31 = vpack.c.bf16 %v2805_v28, %v2805_v28  ;;  %2587 = vmatprep.subr.bf16.mxu1 %v3005_v3 }
 0x198   : > { %v852_v33 = vpop.permute.xlu0 %851 }
 0x199   : > { %998 = vrot.lane.b32.xlu1 %v3267_v31, %s3009_s29  ;;  %1047 = vrot.lane.b32.xlu0 %v3265_v30, %s3009_s29  ;;  %v857_v34 = vsel %vm803_vm3, %v852_v33, 0 }
 0x19a   : > { %2582 = vmatpush3.bf16.xpose.msra.mxu0 %v857_v34 }
 0x19b   : > { %2593 = vmatprep.subr.bf16.mxu0 %v3005_v3 }
 0x19d   : > { %2578 = vmatmul.mubr.msk.bf16.vlgmr.msra.gmra.mxu1 %vm803_vm3, %v792_v16  ;;  %1096 = vrot.lane.b32.xlu1 %v3275_v35, %s3009_s29 }
 0x19e   : > { %1145 = vrot.lane.b32.xlu0 %v3278_v36, %s3009_s29  ;;  %2589 = vmatprep.mubr.msk.bf16.mxu1 %vm3006_vm1, %v3005_v3  ;;  %s3679_s29 = scalar_lea.vmem %s3628_s8, %s3173_s15 }
 0x1a1   : > { %1363 = vrot.lane.b32.xlu1 %v793_v17, %s3011_s14  ;;  %2584 = vmatmul.mubr.msk.bf16.vlgmr.msra.gmra.mxu0 %vm803_vm3, %v793_v17 }
 0x1a2   : > { %1314 = vrot.lane.b32.xlu0 %v792_v16, %s3011_s14  ;;  %2595 = vmatprep.mubr.msk.bf16.mxu0 %vm3006_vm1, %v3005_v3 }
 0x207   : > { %v901_v37 = vpop.permute.xlu1 %900  ;;  %v950_v38 = vpop.permute.xlu0 %949 }
 0x208   : > { %v906_v39 = vsel %vm803_vm3, %v901_v37, 0  ;;  %v955_v40 = vsel %vm803_vm3, %v950_v38, 0 }
 0x209   : > { %2588 = vmatpush3.bf16.xpose.msra.mxu1 %v906_v39  ;;  %2594 = vmatpush3.bf16.xpose.msra.mxu0 %v955_v40 }
 0x20a   : > { %2599 = vmatprep.subr.bf16.mxu1 %v3005_v3  ;;  %2605 = vmatprep.subr.bf16.mxu0 %v3005_v3 }
 0x20b   : > { %v999_v41 = vpop.permute.xlu1 %998  ;;  %v1048_v42 = vpop.permute.xlu0 %1047 }
 0x20c   : > { %v1004_v43 = vsel %vm803_vm3, %v999_v41, 0  ;;  %v1053_v44 = vsel %vm803_vm3, %v1048_v42, 0 }
 0x20f   : > { %v1097_v45 = vpop.permute.xlu1 %1096 }
 0x210   : > { %2590 = vmatmul.mubr.msk.bf16.vlgmr.msra.gmra.mxu1 %vm803_vm3, %v3258_v23  ;;  %2596 = vmatmul.mubr.msk.bf16.vlgmr.msra.gmra.mxu0 %vm803_vm3, %v3256_v22  ;;  %v1146_v46 = vpop.permute.xlu0 %1145  ;;  %v1102_v47 = vsel %vm803_vm3, %v1097_v45, 0 }
 0x211   : > { %2600 = vmatpush3.bf16.xpose.msra.mxu1 %v1004_v43  ;;  %2606 = vmatpush3.bf16.xpose.msra.mxu0 %v1053_v44  ;;  %v1151_v48 = vsel %vm803_vm3, %v1146_v46, 0 }
 0x212   : > { %2601 = vmatprep.mubr.msk.bf16.mxu1 %vm3006_vm1, %v3005_v3  ;;  %2607 = vmatprep.mubr.msk.bf16.mxu0 %vm3006_vm1, %v3005_v3 }
 0x213   : > { %2611 = vmatprep.subr.bf16.mxu1 %v3005_v3  ;;  %2617 = vmatprep.subr.bf16.mxu0 %v3005_v3  ;;  %v1364_v49 = vpop.permute.xlu1 %1363 }
 0x214   : > { %v1315_v50 = vpop.permute.xlu0 %1314  ;;  %v1369_v51 = vsel %vm1319_vm4, %v1364_v49, 0 }
 0x215   : > { %v1321_v52 = vsel %vm1319_vm4, %v1315_v50, 0 }
 0x218   : > { %2602 = vmatmul.mubr.msk.bf16.vlgmr.msra.gmra.mxu1 %vm803_vm3, %v3267_v31  ;;  %2608 = vmatmul.mubr.msk.bf16.vlgmr.msra.gmra.mxu0 %vm803_vm3, %v3265_v30 }
 0x219   : > { %2612 = vmatpush3.bf16.xpose.msra.mxu1 %v1102_v47  ;;  %2618 = vmatpush3.bf16.xpose.msra.mxu0 %v1151_v48 }
 0x21a   : > { %2613 = vmatprep.mubr.msk.bf16.mxu1 %vm3006_vm1, %v3005_v3  ;;  %2619 = vmatprep.mubr.msk.bf16.mxu0 %vm3006_vm1, %v3005_v3 }
 0x21b   : > { %2623 = vmatprep.subr.bf16.mxu1 %v3005_v3  ;;  %2629 = vmatprep.subr.bf16.mxu0 %v3005_v3 }
 0x220   : > { %2614 = vmatmul.mubr.msk.bf16.vlgmr.msra.gmra.mxu1 %vm803_vm3, %v3275_v35  ;;  %2620 = vmatmul.mubr.msk.bf16.vlgmr.msra.gmra.mxu0 %vm803_vm3, %v3278_v36 }
 0x221   : > { %2624 = vmatpush3.bf16.msra.mxu1 %v1321_v52  ;;  %2630 = vmatpush3.bf16.msra.mxu0 %v1369_v51 }
 0x222   : > { %2625 = vmatprep.mubr.msk.bf16.mxu1 %vm3006_vm1, %v3005_v3  ;;  %2631 = vmatprep.mubr.msk.bf16.mxu0 %vm3006_vm1, %v3005_v3 }
 0x223   : > { %2635 = vmatprep.subr.bf16.mxu1 %v3005_v3  ;;  %2641 = vmatprep.subr.bf16.mxu0 %v3005_v3 }
 0x25d   : > { %v844_v53 = vpop.f32.mrf.mxu1 }
 0x25e   : > { %v1193_v54 = vsel %vm803_vm3, %v844_v53, -inf }
 0x25f   : > { %1194 = vmax.xlane.f32.xlu1 %v1193_v54  ;;  %v2579_v55 = vpop.f32.mrf.mxu1 }
 0x261   : > { %v847_v56 = vpop.f32.mrf.mxu1  ;;  %v893_v57 = vpop.f32.mrf.mxu0 }
 0x262   : > { %v1196_v58 = vsel %vm803_vm3, %v893_v57, -inf }
 0x263   : > { %1197 = vmax.xlane.f32.xlu0 %v1196_v58  ;;  %v2580_v59 = vpop.f32.mrf.mxu1  ;;  %v2585_v60 = vpop.f32.mrf.mxu0 }
 0x265   : > { %v896_v61 = vpop.f32.mrf.mxu0 }
 0x267   : > { %v2586_v62 = vpop.f32.mrf.mxu0 }
 0x2d0   : > { %v942_v63 = vpop.f32.mrf.mxu1  ;;  %v991_v0 = vpop.f32.mrf.mxu0 }
 0x2d1   : > { %v1202_v1 = vsel %vm803_vm3, %v991_v0, -inf  ;;  %v1199_v2 = vsel %vm803_vm3, %v942_v63, -inf }
 0x2d2   : > { %v2597_v4 = vpop.f32.mrf.mxu0  ;;  %1203 = vmax.xlane.f32.xlu1 %v1202_v1  ;;  %1200 = vmax.xlane.f32.xlu0 %v1199_v2  ;;  %v2591_v7 = vpop.f32.mrf.mxu1 }
 0x2d4   : > { %v945_v8 = vpop.f32.mrf.mxu1  ;;  %v994_v9 = vpop.f32.mrf.mxu0 }
 0x2d6   : > { %v2592_v10 = vpop.f32.mrf.mxu1  ;;  %v2598_v11 = vpop.f32.mrf.mxu0 }
 0x2d8   : > { %v3336_v12 = vpop.f32.mrf.mxu1  ;;  %v1089_v13 = vpop.f32.mrf.mxu0 }
 0x2d9   : > { %v1208_v14 = vsel %vm803_vm3, %v1089_v13, -inf  ;;  %v1205_v15 = vsel %vm803_vm3, %v3336_v12, -inf }
 0x2da   : > { %v2609_v16 = vpop.f32.mrf.mxu0  ;;  %1209 = vmax.xlane.f32.xlu1 %v1208_v14  ;;  %1206 = vmax.xlane.f32.xlu0 %v1205_v15  ;;  %v2603_v17 = vpop.f32.mrf.mxu1 }
 0x2dc   : > { %v1043_v18 = vpop.f32.mrf.mxu1  ;;  %v1092_v19 = vpop.f32.mrf.mxu0 }
 0x2de   : > { %v2604_v20 = vpop.f32.mrf.mxu1  ;;  %v2610_v21 = vpop.f32.mrf.mxu0 }
 0x2e0   : > { %v3341_v24 = vpop.f32.mrf.mxu1  ;;  %v1187_v25 = vpop.f32.mrf.mxu0 }
 0x2e1   : > { %v1214_v26 = vsel %vm803_vm3, %v1187_v25, -inf  ;;  %v1211_v27 = vsel %vm803_vm3, %v3341_v24, -inf }
 0x2e2   : > { %v2621_v28 = vpop.f32.mrf.mxu0  ;;  %1215 = vmax.xlane.f32.xlu1 %v1214_v26  ;;  %1212 = vmax.xlane.f32.xlu0 %v1211_v27  ;;  %v2615_v29 = vpop.f32.mrf.mxu1 }
 0x2e4   : > { %v1141_v32 = vpop.f32.mrf.mxu1  ;;  %v1190_v33 = vpop.f32.mrf.mxu0 }
 0x2e6   : > { %v2616_v34 = vpop.f32.mrf.mxu1  ;;  %v2622_v37 = vpop.f32.mrf.mxu0 }
 0x2e8   : > { %v1195_v38 = vpop.xlane.xlu1 %1194 }
 0x2e9   : > { %v1217_v40 = vsub.f32 %v844_v53, %v1195_v38 }
 0x2eb   : > { %v1225_v42 = vmul.f32 1.442695, %v1217_v40 }
 0x2ec   : > { %v1198_v39 = vpop.xlane.xlu0 %1197 }
 0x2ed   : > { %v1218_v41 = vsub.f32 %v893_v57, %v1198_v39  ;;  %2820 = vpow2.f32 %v1225_v42 }
 0x2ef   : > { %v1227_v43 = vmul.f32 1.442695, %v1218_v41 }
 0x2f1   : > { %2822 = vpow2.f32 %v1227_v43 }
 0x2f3   : > { %1411 = vrot.lane.b32.xlu1 %v3258_v23, %s3011_s14 }
 0x2f8   : > { %1459 = vrot.lane.b32.xlu0 %v3256_v22, %s3011_s14 }
 0x2fa   : > { %v2821_v44 = vpop.eup %2820 }
 0x2fb   : > { %v1241_v47 = vsel %vm803_vm3, %v2821_v44, 0.0 }
 0x2fe   : > { %v2823_v45 = vpop.eup %2822 }
 0x2ff   : > { %v1244_v46 = vsel %vm803_vm3, %v2823_v45, 0.0 }
 0x317   : > { %1245 = vadd.xlane.f32.xlu1 %v1244_v46  ;;  %1242 = vadd.xlane.f32.xlu0 %v1241_v47 }
 0x328   : > { %1507 = vrot.lane.b32.xlu1 %v3267_v31, %s3011_s14 }
 0x35b   : > { %v1204_v22 = vpop.xlane.xlu1 %1203  ;;  %v1201_v23 = vpop.xlane.xlu0 %1200 }
 0x35c   : > { %v1220_v48 = vsub.f32 %v991_v0, %v1204_v22  ;;  %v1219_v49 = vsub.f32 %v942_v63, %v1201_v23 }
 0x35e   : > { %v1231_v50 = vmul.f32 1.442695, %v1220_v48  ;;  %v1229_v51 = vmul.f32 1.442695, %v1219_v49 }
 0x360   : > { %2824 = vpow2.f32 %v1231_v50 }
 0x361   : > { %2826 = vpow2.f32 %v1229_v51 }
 0x363   : > { %v1210_v52 = vpop.xlane.xlu1 %1209  ;;  %v1207_v1 = vpop.xlane.xlu0 %1206 }
 0x364   : > { %v1222_v53 = vsub.f32 %v1089_v13, %v1210_v52  ;;  %v1221_v2 = vsub.f32 %v3336_v12, %v1207_v1 }
 0x366   : > { %v1235_v54 = vmul.f32 1.442695, %v1222_v53  ;;  %v1233_v7 = vmul.f32 1.442695, %v1221_v2 }
 0x368   : > { %2828 = vpow2.f32 %v1235_v54 }
 0x36b   : > { %v1216_v55 = vpop.xlane.xlu1 %1215  ;;  %v1213_v4 = vpop.xlane.xlu0 %1212 }
 0x36c   : > { %v1224_v56 = vsub.f32 %v1187_v25, %v1216_v55  ;;  %v1223_v8 = vsub.f32 %v3341_v24, %v1213_v4 }
 0x36d   : > { %v2825_v57 = vpop.eup %2824 }
 0x36e   : > { %v3354_v58 = vpop.eup %2826  ;;  %v1239_v59 = vmul.f32 1.442695, %v1224_v56  ;;  %v1250_v31 = vsel %vm803_vm3, %v2825_v57, 0.0  ;;  %v1237_v9 = vmul.f32 1.442695, %v1223_v8 }
 0x36f   : > { %1251 = vadd.xlane.f32.xlu1 %v1250_v31  ;;  %v1247_v60 = vsel %vm803_vm3, %v3354_v58, 0.0  ;;  %v1412_v10 = vpop.permute.xlu1 %1411  ;;  %v1460_v11 = vpop.permute.xlu0 %1459 }
 0x370   : > { %2830 = vpow2.f32 %v1239_v59  ;;  %1248 = vadd.xlane.f32.xlu0 %v1247_v60  ;;  %v1465_v24 = vsel %vm1319_vm4, %v1460_v11, 0  ;;  %v1417_v25 = vsel %vm1319_vm4, %v1412_v10, 0 }
 0x371   : > { %2832 = vpow2.f32 %v1233_v7 }
 0x372   : > { %2834 = vpow2.f32 %v1237_v9 }
 0x375   : > { %v3359_v61 = vpop.eup %2828 }
 0x376   : > { %v1256_v62 = vsel %vm803_vm3, %v3359_v61, 0.0 }
 0x377   : > { %1257 = vadd.xlane.f32.xlu1 %v1256_v62 }
 0x37d   : > { %v3363_v63 = vpop.eup %2830 }
 0x37e   : > { %v1262_v0 = vsel %vm803_vm3, %v3363_v63, 0.0  ;;  %v3373_v15 = vpop.eup %2832 }
 0x37f   : > { %1263 = vadd.xlane.f32.xlu1 %v1262_v0  ;;  %v3377_v12 = vpop.eup %2834 }
 0x386   : > { %1555 = vrot.lane.b32.xlu0 %v3265_v30, %s3011_s14  ;;  %v1253_v30 = vsel %vm803_vm3, %v3373_v15, 0.0 }
 0x390   : > { %1603 = vrot.lane.b32.xlu1 %v3275_v35, %s3011_s14  ;;  %v1259_v35 = vsel %vm803_vm3, %v3377_v12, 0.0 }
 0x3a0   : > { %v1246_v13 = vpop.xlane.xlu1 %1245  ;;  %v1243_v14 = vpop.xlane.xlu0 %1242 }
 0x3a1   : > { %2836 = vrcp.f32 %v1246_v13 }
 0x3a2   : > { %2838 = vrcp.f32 %v1243_v14 }
 0x3a4   : > { %v1508_v26 = vpop.permute.xlu1 %1507 }
 0x3a5   : > { %1254 = vadd.xlane.f32.xlu0 %v1253_v30  ;;  %v2480_v30 = vld [vmem:[%s3186_s25 + $0x4] sm:$0xf] }
 0x3a9   : > { %1260 = vadd.xlane.f32.xlu0 %v1259_v35 }
 0x3ae   : > { %v2837_v16 = vpop.eup %2836 }
 0x3af   : > { %v2839_v17 = vpop.eup %2838  ;;  %v1282_v18 = vmul.f32 %v2837_v16, %v2823_v45 }
 0x3b0   : > { %v3381_v19 = vmul.f32 %v2839_v17, %v2821_v44 }
 0x3b1   : > { %v1307_v20 = vpack.c.bf16 %v1282_v18, %v1282_v18  ;;  %v1296_v47 = vsel %vm803_vm3, %v1282_v18, 0.0 }
 0x3b2   : > { %v1306_v21 = vpack.c.bf16 %v3381_v19, %v3381_v19  ;;  %v1289_v0 = vsel %vm803_vm3, %v3381_v19, 0.0 }
 0x3b3   : > { %2632 = vmatmul.mubr.msk.bf16.vlgmr.msra.gmra.mxu0 %vm803_vm3, %v1307_v20 }
 0x3b4   : > { %2626 = vmatmul.mubr.msk.bf16.vlgmr.msra.gmra.mxu1 %vm803_vm3, %v1306_v21  ;;  %2642 = vmatpush3.bf16.msra.mxu0 %v1465_v24 }
 0x3b5   : > { %2636 = vmatpush3.bf16.msra.mxu1 %v1417_v25  ;;  %2637 = vmatprep.mubr.msk.bf16.mxu1 %vm3006_vm1, %v3005_v3 }
 0x3b6   : > { %2643 = vmatprep.mubr.msk.bf16.mxu0 %vm3006_vm1, %v3005_v3  ;;  %2647 = vmatprep.subr.bf16.mxu1 %v3005_v3 }
 0x3b7   : > { %2653 = vmatprep.subr.bf16.mxu0 %v3005_v3 }
 0x3bf   : > { %1651 = vrot.lane.b32.xlu0 %v3278_v36, %s3011_s14  ;;  %v1513_v36 = vsel %vm1319_vm4, %v1508_v26, 0  ;;  %v2485_v26 = vld [vmem:[%s3186_s25 + $0xc] sm:$0xf]  ;;  %s3680_s14 = sld [smem:[#allocation15_spill]] }
 0x3c5   : > { %s2514_s23 = sshll.u32 %s3680_s14, 8 }
 0x3f8   : > { %v1252_v27 = vpop.xlane.xlu1 %1251 }
 0x3f9   : > { %2840 = vrcp.f32 %v1252_v27  ;;  %v1249_v28 = vpop.xlane.xlu0 %1248  ;;  %v1857_v27 = vsel %vm1319_vm4, %v2485_v26, 0 }
 0x3fa   : > { %2842 = vrcp.f32 %v1249_v28  ;;  %v2483_v28 = vld [vmem:[%s3186_s25 + $0x8] sm:$0xf] }
 0x3fd   : > { %v1556_v37 = vpop.permute.xlu0 %1555 }
 0x3fe   : > { %v1561_v42 = vsel %vm1319_vm4, %v1556_v37, 0  ;;  %v1805_v37 = vsel %vm1319_vm4, %v2483_v28, 0 }
 0x400   : > { %v1258_v29 = vpop.xlane.xlu1 %1257 }
 0x401   : > { %2844 = vrcp.f32 %v1258_v29 }
 0x406   : > { %v2841_v32 = vpop.eup %2840 }
 0x407   : > { %v2843_v33 = vpop.eup %2842  ;;  %v1284_v34 = vmul.f32 %v2841_v32, %v2825_v57  ;;  %v1700_v57 = vld [vmem:[%s3186_s25] sm:$0xf]  ;;  %s3681_s25 = sld [smem:[#allocation22_spill]] }
 0x408   : > { %v1264_v38 = vpop.xlane.xlu1 %1263  ;;  %v1283_v39 = vmul.f32 %v2843_v33, %v3354_v58  ;;  %v1755_v31 = vsel %vm1319_vm4, %v1700_v57, 0 }
 0x409   : > { %2846 = vrcp.f32 %v1264_v38  ;;  %v1309_v40 = vpack.c.bf16 %v1284_v34, %v1284_v34  ;;  %v1297_v46 = vsel %vm803_vm3, %v1284_v34, 0.0 }
 0x40a   : > { %v1308_v41 = vpack.c.bf16 %v1283_v39, %v1283_v39  ;;  %v1298_v48 = vadd.f32 %v1297_v46, %v1296_v47 }
 0x40b   : > { %2644 = vmatmul.mubr.msk.bf16.vlgmr.msra.gmra.mxu0 %vm803_vm3, %v1309_v40 }
 0x40c   : > { %2638 = vmatmul.mubr.msk.bf16.vlgmr.msra.gmra.mxu1 %vm803_vm3, %v1308_v41  ;;  %2654 = vmatpush3.bf16.msra.mxu0 %v1561_v42 }
 0x40d   : > { %2648 = vmatpush3.bf16.msra.mxu1 %v1513_v36  ;;  %2655 = vmatprep.mubr.msk.bf16.mxu0 %vm3006_vm1, %v3005_v3  ;;  %s2179_s3 = scalar_lea.sflag [#allocation8], %s3681_s25 }
 0x40e   : > { %v2845_v43 = vpop.eup %2844  ;;  %2665 = vmatprep.subr.bf16.mxu0 %v3005_v3  ;;  %2649 = vmatprep.mubr.msk.bf16.mxu1 %vm3006_vm1, %v3005_v3 }
 0x40f   : > { %v1286_v44 = vmul.f32 %v2845_v43, %v3359_v61  ;;  %2659 = vmatprep.subr.bf16.mxu1 %v3005_v3  ;;  %v1290_v61 = vsel %vm803_vm3, %v1283_v39, 0.0 }
 0x410   : > { %v1291_v7 = vadd.f32 %v1290_v61, %v1289_v0 }
 0x411   : > { %v1311_v45 = vpack.c.bf16 %v1286_v44, %v1286_v44  ;;  %v1299_v22 = vsel %vm803_vm3, %v1286_v44, 0.0 }
 0x412   : > { %v1300_v50 = vadd.f32 %v1299_v22, %v1298_v48 }
 0x413   : > { %2656 = vmatmul.mubr.msk.bf16.vlgmr.msra.gmra.mxu0 %vm803_vm3, %v1311_v45 }
 0x414   : > { %2667 = vmatprep.mubr.msk.bf16.mxu0 %vm3006_vm1, %v3005_v3 }
 0x416   : > { %v2847_v23 = vpop.eup %2846 }
 0x417   : > { %v1288_v49 = vmul.f32 %v2847_v23, %v3363_v63  ;;  %v1604_v63 = vpop.permute.xlu1 %1603 }
 0x418   : > { %v1609_v8 = vsel %vm1319_vm4, %v1604_v63, 0 }
 0x419   : > { %v1301_v51 = vsel %vm803_vm3, %v1288_v49, 0.0  ;;  %v1313_v59 = vpack.c.bf16 %v1288_v49, %v1288_v49 }
 0x41a   : > { %v1302_v52 = vadd.f32 %v1301_v51, %v1300_v50 }
 0x41c   : > { %v1305_v53 = vmul.f32 0.25, %v1302_v52 }
 0x41e   : > { %2172 = vst.msk [vmem:[%s3229_s30 + $0x8] sm:$0xff] %vm803_vm3, %v1305_v53 }
 0x42e   : > { %v1255_v54 = vpop.xlane.xlu0 %1254 }
 0x42f   : > { %2848 = vrcp.f32 %v1255_v54 }
 0x432   : > { %v1261_v55 = vpop.xlane.xlu0 %1260 }
 0x433   : > { %2850 = vrcp.f32 %v1261_v55 }
 0x436   : > { %v1652_v56 = vpop.permute.xlu0 %1651 }
 0x437   : > { %v1657_v58 = vsel %vm1319_vm4, %v1652_v56, 0 }
 0x438   : > { %2666 = vmatpush3.bf16.msra.mxu0 %v1657_v58 }
 0x439   : > { %2677 = vmatprep.subr.bf16.mxu0 %v3005_v3 }
 0x43b   : > { %2668 = vmatmul.mubr.msk.bf16.vlgmr.msra.gmra.mxu0 %vm803_vm3, %v1313_v59 }
 0x43c   : > { %v2849_v60 = vpop.eup %2848  ;;  %2678 = vmatpush3.bf16.msra.mxu0 %v1755_v31  ;;  %2679 = vmatprep.mubr.msk.bf16.mxu0 %vm3006_vm1, %v3005_v3 }
 0x43d   : > { %v1285_v62 = vmul.f32 %v2849_v60, %v3373_v15  ;;  %2689 = vmatprep.subr.bf16.mxu0 %v3005_v3 }
 0x43f   : > { %v1292_v1 = vsel %vm803_vm3, %v1285_v62, 0.0  ;;  %v1310_v2 = vpack.c.bf16 %v1285_v62, %v1285_v62 }
 0x440   : > { %v2851_v4 = vpop.eup %2850  ;;  %v1293_v10 = vadd.f32 %v1292_v1, %v1291_v7 }
 0x441   : > { %2650 = vmatmul.mubr.msk.bf16.vlgmr.msra.gmra.mxu1 %vm803_vm3, %v1310_v2  ;;  %v1287_v9 = vmul.f32 %v2851_v4, %v3377_v12  ;;  %v1708_v12 = vsel %vm1319_vm4, %v2480_v30, 0 }
 0x442   : > { %2660 = vmatpush3.bf16.msra.mxu1 %v1609_v8  ;;  %2661 = vmatprep.mubr.msk.bf16.mxu1 %vm3006_vm1, %v3005_v3 }
 0x443   : > { %2671 = vmatprep.subr.bf16.mxu1 %v3005_v3  ;;  %v1294_v11 = vsel %vm803_vm3, %v1287_v9, 0.0  ;;  %v1312_v15 = vpack.c.bf16 %v1287_v9, %v1287_v9 }
 0x444   : > { %v1295_v13 = vadd.f32 %v1294_v11, %v1293_v10  ;;  %v2487_v11 = vld [vmem:[%s3676_s21] ss:$0 sm:$0xff] }
 0x446   : > { %v1304_v14 = vmul.f32 0.25, %v1295_v13 }
 0x448   : > { %2171 = vst.msk [vmem:[%s3229_s30] sm:$0xff] %vm803_vm3, %v1304_v14 }
 0x449   : > { %2662 = vmatmul.mubr.msk.bf16.vlgmr.msra.gmra.mxu1 %vm803_vm3, %v1312_v15 }
 0x44a   : > { %2673 = vmatprep.mubr.msk.bf16.mxu1 %vm3006_vm1, %v3005_v3  ;;  %2672 = vmatpush3.bf16.msra.mxu1 %v1708_v12 }
 0x44b   : > { %2683 = vmatprep.subr.bf16.mxu1 %v3005_v3 }
 0x473   : > { %v1405_v35 = vpop.f32.mrf.mxu0 }
 0x474   : > { %v1357_v16 = vpop.f32.mrf.mxu1 }
 0x475   : > { %v1699_v17 = vpack.c.bf16 %v1405_v35, %v1357_v16  ;;  %v2633_v18 = vpop.f32.mrf.mxu0 }
 0x476   : > { %v2627_v19 = vpop.f32.mrf.mxu1 }
 0x477   : > { %2680 = vmatmul.mubr.msk.bf16.vlgmr.msra.gmra.mxu0 %vm803_vm3, %v1699_v17  ;;  %v1408_v20 = vpop.f32.mrf.mxu0 }
 0x478   : > { %v1360_v21 = vpop.f32.mrf.mxu1  ;;  %2691 = vmatprep.mubr.msk.bf16.mxu0 %vm3006_vm1, %v3005_v3  ;;  %2690 = vmatpush3.bf16.msra.mxu0 %v1857_v27 }
 0x479   : > { %v2634_v24 = vpop.f32.mrf.mxu0  ;;  %2703 = vmatprep.subr.bf16.mxu0 %v3005_v3 }
 0x47a   : > { %v2628_v25 = vpop.f32.mrf.mxu1 }
 0x4cb   : > { %v1501_v29 = vpop.f32.mrf.mxu0 }
 0x4cc   : > { %v1453_v32 = vpop.f32.mrf.mxu1 }
 0x4cd   : > { %v1701_v33 = vpack.c.bf16 %v1501_v29, %v1453_v32  ;;  %v2645_v34 = vpop.f32.mrf.mxu0 }
 0x4ce   : > { %v2639_v38 = vpop.f32.mrf.mxu1 }
 0x4cf   : > { %2674 = vmatmul.mubr.msk.bf16.vlgmr.msra.gmra.mxu1 %vm803_vm3, %v1701_v33  ;;  %v1504_v39 = vpop.f32.mrf.mxu0  ;;  %v2815_v38 = vld [vmem:[%s3203_s24] sm:$0xff]  }
 0x4d0   : > { %v1456_v40 = vpop.f32.mrf.mxu1  ;;  %2684 = vmatpush3.bf16.msra.mxu1 %v1805_v37  ;;  %2685 = vmatprep.mubr.msk.bf16.mxu1 %vm3006_vm1, %v3005_v3 }
 0x4d1   : > { %v2646_v41 = vpop.f32.mrf.mxu0  ;;  %2695 = vmatprep.subr.bf16.mxu1 %v3005_v3 }
 0x4d2   : > { %v2640_v42 = vpop.f32.mrf.mxu1 }
 0x4d3   : > { %v1597_v36 = vpop.f32.mrf.mxu0 }
 0x4d5   : > { %v2657_v43 = vpop.f32.mrf.mxu0 }
 0x4d7   : > { %v1600_v44 = vpop.f32.mrf.mxu0 }
 0x4d9   : > { %v2658_v45 = vpop.f32.mrf.mxu0 }
 0x4fb   : > { %v1693_v46 = vpop.f32.mrf.mxu0 }
 0x4fd   : > { %v2669_v47 = vpop.f32.mrf.mxu0 }
 0x4ff   : > { %v1696_v22 = vpop.f32.mrf.mxu0 }
 0x501   : > { %v1549_v23 = vpop.f32.mrf.mxu1  ;;  %v2670_v48 = vpop.f32.mrf.mxu0 }
 0x502   : > { %v1798_v49 = vpack.c.bf16 %v1597_v36, %v1549_v23  ;;  %v2489_v48 = vld [vmem:[%s3678_s22] ss:$0 sm:$0xff]  ;;  %s2890_s22 = scalar_lea.vmem %s3520_s1, 256 }
 0x503   : > { %v2651_v50 = vpop.f32.mrf.mxu1  ;;  %p2891_p11 = scmp.ne.s32.totalorder %s3520_s1, %s2890_s22 }
 0x504   : > { %2686 = vmatmul.mubr.msk.bf16.vlgmr.msra.gmra.mxu1 %vm803_vm3, %v1798_v49 }
 0x505   : > { %v1552_v51 = vpop.f32.mrf.mxu1  ;;  %2699 = vmatprep.mubr.msk.bf16.mxu1 %vm3006_vm1, %v3005_v3  ;;  %p2892_p13 = pnand %p2891_p11, %p3131_p4 }
 0x507   : > { %v2652_v52 = vpop.f32.mrf.mxu1  ;;  %p2893_p0 = pneg %p2892_p13 }
 0x509   : > { %v1645_v53 = vpop.f32.mrf.mxu1 }
 0x50a   : > { %v1850_v54 = vpack.c.bf16 %v1693_v46, %v1645_v53  ;;  %v2816_v53 = vld [vmem:[%s3213_s13 + $0x18] sm:$0xff]  }
 0x50b   : > { %v2663_v55 = vpop.f32.mrf.mxu1 }
 0x50c   : > { %2692 = vmatmul.mubr.msk.bf16.vlgmr.msra.gmra.mxu0 %vm803_vm3, %v1850_v54  ;;  %v2817_v54 = vld [vmem:[%s3213_s13 + $0x10] sm:$0xff]   ;;  %v2818_v55 = vld [vmem:[%s3213_s13 + $0x8] sm:$0xff]  }
 0x50d   : > { %v1648_v56 = vpop.f32.mrf.mxu1  ;;  %2711 = vmatprep.mubr.msk.bf16.mxu0 %vm3006_vm1, %v3005_v3  ;;  %2704 = vmatpush3.bf16.msra.mxu0 %v2816_v53 }
 0x50e   : > { %2705 = vmatprep.subr.bf16.mxu0 %v3005_v3  ;;  %v2819_v56 = vld [vmem:[%s3213_s13] sm:$0xff]  }
 0x50f   : > { %v2664_v57 = vpop.f32.mrf.mxu1 }
 0x510   : > { %v2490_v57 = vld [vmem:[%s3679_s29] ss:$0 sm:$0xff]  ;;  %s2896_s29 = scalar_lea.vmem %s2895_s26, 512 }
 0x511   : > { %2706 = vmatpush3.bf16.msra.mxu0 %v2817_v54  ;;  %p2898_p2 = scmp.lt.s32.totalorder %s2896_s29, %s2890_s22 }
 0x512   : > { %2707 = vmatprep.subr.bf16.mxu0 %v3005_v3 }
 0x513   : > { %p2899_p3 = por %p2898_p2, %p2897_p1 }
 0x515   : > { %2708 = vmatpush3.bf16.msra.mxu0 %v2818_v55  ;;  %p2900_p5 = pnand %p2899_p3, %p2893_p0 }
 0x516   : > { %2709 = vmatprep.subr.bf16.mxu0 %v3005_v3 }
 0x519   : > { %2710 = vmatpush3.bf16.msra.mxu0 %v2819_v56 }
 0x537   : > { %v1791_v58 = vpop.f32.mrf.mxu0 }
 0x539   : > { %v2681_v59 = vpop.f32.mrf.mxu0 }
 0x53b   : > { %v1794_v31 = vpop.f32.mrf.mxu0 }
 0x53d   : > { %v2682_v60 = vpop.f32.mrf.mxu0 }
 0x58f   : > { %v1744_v61 = vpop.f32.mrf.mxu1 }
 0x590   : > { %v1792_v7 = vadd.f32 %v1791_v58, %v1744_v61 }
 0x591   : > { %v2675_v62 = vpop.f32.mrf.mxu1 }
 0x593   : > { %v1747_v63 = vpop.f32.mrf.mxu1 }
 0x594   : > { %v1795_v13 = vadd.f32 %v1794_v31, %v1747_v63 }
 0x595   : > { %v2676_v0 = vpop.f32.mrf.mxu1 }
 0x5c4   : > { %v1841_v1 = vpop.f32.mrf.mxu1 }
 0x5c5   : > { %v1848_v9 = vadd.f32 %v1841_v1, %v1792_v7 }
 0x5c6   : > { %v2687_v2 = vpop.f32.mrf.mxu1 }
 0x5c8   : > { %v1844_v4 = vpop.f32.mrf.mxu1 }
 0x5c9   : > { %v1849_v30 = vadd.f32 %v1844_v4, %v1795_v13  ;;  %v2494_v13 = vld [vmem:[%s682_s16] ss:$0 sm:$0xff] }
 0x5ca   : > { %v2688_v8 = vpop.f32.mrf.mxu1 }
 0x5cc   : > { %v1893_v10 = vpop.f32.mrf.mxu0 }
 0x5cd   : > { %v1900_v14 = vadd.f32 %v1893_v10, %v1848_v9 }
 0x5ce   : > { %v2693_v15 = vpop.f32.mrf.mxu0 }
 0x5cf   : > { %v1909_v12 = vadd.f32 %v2487_v11, %v1900_v14 }
 0x5d0   : > { %v1896_v35 = vpop.f32.mrf.mxu0 }
 0x5d1   : > { %v1901_v16 = vadd.f32 %v1896_v35, %v1849_v30  ;;  %v1911_v17 = vadd.f32 %v1909_v12, %v3236_v5 }
 0x5d2   : > { %v2694_v18 = vpop.f32.mrf.mxu0 }
 0x5d3   : > { %v1910_v19 = vadd.f32 %v2487_v11, %v1901_v16  ;;  %v1915_v20 = vsel %vm727_vm2, %v1911_v17, 0.0 }
 0x5d4   : > { %1916 = vadd.xlane.f32.xlu1 %v1915_v20 }
 0x5d5   : > { %v1912_v21 = vadd.f32 %v1910_v19, %v3238_v6  ;;  %v2814_v6 = vld [vmem:[%s3203_s24 + $0x8] sm:$0xff]   ;;  %s3677_s24 = scalar_lea.vmem %s3625_s5, %s3173_s15 }
 0x5d6   : > { %2696 = vmatpush3.bf16.msra.mxu1 %v2814_v6  ;;  %v2488_v46 = vld [vmem:[%s3677_s24] ss:$0 sm:$0xff]  ;;  %s3517_s24 = scalar_lea.hbm %s3683_s28, %s2514_s23 }
 0x5d7   : > { %v1918_v24 = vsel %vm727_vm2, %v1912_v21, 0.0  ;;  %2697 = vmatprep.subr.bf16.mxu1 %v3005_v3 }
 0x5d8   : > { %1919 = vadd.xlane.f32.xlu0 %v1918_v24 }
 0x5da   : > { %2698 = vmatpush3.bf16.msra.mxu1 %v2815_v38 }
 0x65d   : > { %v1917_v25 = vpop.xlane.xlu1 %1916 }
 0x65e   : > { %v1922_v26 = vmul.f32 0.03125, %v1917_v25 }
 0x660   : > { %v1924_v27 = vsub.f32 %v1911_v17, %v1922_v26 }
 0x661   : > { %v1920_v28 = vpop.xlane.xlu0 %1919 }
 0x662   : > { %v1923_v29 = vmul.f32 0.03125, %v1920_v28  ;;  %v1926_v32 = vmul.f32 %v1924_v27, %v1924_v27 }
 0x664   : > { %v1925_v33 = vsub.f32 %v1912_v21, %v1923_v29  ;;  %v1928_v5 = vsel %vm727_vm2, %v1926_v32, 0.0 }
 0x665   : > { %1929 = vadd.xlane.f32.xlu0 %v1928_v5 }
 0x666   : > { %v1927_v34 = vmul.f32 %v1925_v33, %v1925_v33 }
 0x668   : > { %v1931_v37 = vsel %vm727_vm2, %v1927_v34, 0.0 }
 0x669   : > { %1932 = vadd.xlane.f32.xlu1 %v1931_v37 }
 0x6ee   : > { %v1930_v39 = vpop.xlane.xlu0 %1929 }
 0x6ef   : > { %v1934_v40 = vmul.f32 0.03125, %v1930_v39 }
 0x6f1   : > { %v1936_v41 = vadd.f32 1e-12, %v1934_v40 }
 0x6f2   : > { %v1933_v42 = vpop.xlane.xlu1 %1932 }
 0x6f3   : > { %2852 = vrsqrt.f32 %v1936_v41  ;;  %v1935_v36 = vmul.f32 0.03125, %v1933_v42 }
 0x6f5   : > { %v1937_v43 = vadd.f32 1e-12, %v1935_v36 }
 0x6f7   : > { %2854 = vrsqrt.f32 %v1937_v43 }
 0x700   : > { %v2853_v44 = vpop.eup %2852 }
 0x701   : > { %v1940_v45 = vmul.f32 %v2853_v44, %v1924_v27 }
 0x703   : > { %v1948_v23 = vmul.f32 %v2488_v46, %v1940_v45 }
 0x704   : > { %v2855_v47 = vpop.eup %2854 }
 0x705   : > { %v1941_v22 = vmul.f32 %v2855_v47, %v1925_v33  ;;  %v1956_v50 = vadd.f32 %v2489_v48, %v1948_v23 }
 0x707   : > { %v1949_v49 = vmul.f32 %v2488_v46, %v1941_v22 }
 0x709   : > { %v1957_v51 = vadd.f32 %v2489_v48, %v1949_v49 }
 0x70b   : > { %v1958_v52 = vpack.c.bf16 %v1957_v51, %v1956_v50 }
 0x70d   : > { %2700 = vmatmul.mubr.msk.bf16.vlgmr.msra.gmra.mxu1 %vm727_vm2, %v1958_v52 }
 0x7cd   : > { %v2019_v58 = vpop.f32.mrf.mxu1 }
 0x7ce   : > { %v2020_v59 = vadd.f32 %v2490_v57, %v2019_v58 }
 0x7cf   : > { %v2701_v31 = vpop.f32.mrf.mxu1 }
 0x7d0   : > { %v2028_v60 = vmul.f32 0.70710677, %v2020_v59  ;;  %v2026_v4 = vmul.f32 0.5, %v2020_v59 }
 0x7d1   : > { %v2022_v61 = vpop.f32.mrf.mxu1 }
 0x7d2   : > { %2856 = verf.f32 %v2028_v60  ;;  %v2023_v62 = vadd.f32 %v2490_v57, %v2022_v61 }
 0x7d3   : > { %v2702_v63 = vpop.f32.mrf.mxu1 }
 0x7d4   : > { %v2029_v0 = vmul.f32 0.70710677, %v2023_v62  ;;  %v2027_v7 = vmul.f32 0.5, %v2023_v62 }
 0x7d6   : > { %2858 = verf.f32 %v2029_v0 }
 0x7df   : > { %v2857_v1 = vpop.eup %2856 }
 0x7e0   : > { %v2032_v3 = vadd.f32 1.0, %v2857_v1 }
 0x7e2   : > { %v2034_v9 = vmul.f32 %v2032_v3, %v2026_v4 }
 0x7e3   : > { %v2859_v2 = vpop.eup %2858 }
 0x7e4   : > { %v2033_v8 = vadd.f32 1.0, %v2859_v2 }
 0x7e6   : > { %v2035_v10 = vmul.f32 %v2033_v8, %v2027_v7 }
 0x7e8   : > { %v2036_v11 = vpack.c.bf16 %v2035_v10, %v2034_v9 }
 0x7ea   : > { %2712 = vmatmul.mubr.msk.bf16.vlgmr.msra.gmra.mxu0 %vm2076_vm5, %v2036_v11 }
 0x8aa   : > { %v2114_v14 = vpop.f32.mrf.mxu0 }
 0x8ab   : > { %v2115_v15 = vadd.f32 %v2494_v13, %v2114_v14 }
 0x8ac   : > { %v2713_v30 = vpop.f32.mrf.mxu0 }
 0x8ad   : > { %v2121_v12 = vadd.f32 %v2115_v15, %v1956_v50 }
 0x8ae   : > { %v2117_v35 = vpop.f32.mrf.mxu0 }
 0x8af   : > { %v2118_v16 = vadd.f32 %v2494_v13, %v2117_v35  ;;  %v2125_v17 = vsel %vm727_vm2, %v2121_v12, 0.0 }
 0x8b0   : > { %2126 = vadd.xlane.f32.xlu0 %v2125_v17  ;;  %v2714_v18 = vpop.f32.mrf.mxu0 }
 0x8b1   : > { %v2122_v19 = vadd.f32 %v2118_v16, %v1957_v51 }
 0x8b3   : > { %v2128_v20 = vsel %vm727_vm2, %v2122_v19, 0.0 }
 0x8b4   : > { %2129 = vadd.xlane.f32.xlu1 %v2128_v20 }
 0x939   : > { %v2127_v21 = vpop.xlane.xlu0 %2126 }
 0x93a   : > { %v2131_v24 = vmul.f32 0.03125, %v2127_v21 }
 0x93c   : > { %v2133_v25 = vsub.f32 %v2121_v12, %v2131_v24 }
 0x93d   : > { %v2130_v26 = vpop.xlane.xlu1 %2129 }
 0x93e   : > { %v2132_v27 = vmul.f32 0.03125, %v2130_v26  ;;  %v2135_v28 = vmul.f32 %v2133_v25, %v2133_v25 }
 0x940   : > { %v2134_v29 = vsub.f32 %v2122_v19, %v2132_v27  ;;  %v2137_v32 = vsel %vm727_vm2, %v2135_v28, 0.0 }
 0x941   : > { %2138 = vadd.xlane.f32.xlu0 %v2137_v32 }
 0x942   : > { %v2136_v33 = vmul.f32 %v2134_v29, %v2134_v29 }
 0x944   : > { %v2140_v5 = vsel %vm727_vm2, %v2136_v33, 0.0 }
 0x945   : > { %2141 = vadd.xlane.f32.xlu1 %v2140_v5 }
 0x946   : > { %2903 = shalt.err (!%p2900_p5)
}
 0x947   : > { %s2904_s30 = scalar_lea.hbm %s3517_s24, 256  ;;  %s2908_s21 = scalar_lea.hbm %s3683_s28, 512 }
 0x948   : > { %p2905_p6 = scmp.ne.s32.totalorder %s3517_s24, %s2904_s30  ;;  %p2909_p12 = scmp.lt.s32.totalorder %s3517_s24, %s3683_s28 }
 0x949   : > { %p2910_p10 = scmp.lt.s32.totalorder %s2908_s21, %s2904_s30 }
 0x94a   : > { %p2906_p7 = pnand %p2905_p6, %p3131_p4 }
 0x94b   : > { %p2911_p11 = por %p2910_p10, %p2909_p12 }
 0x94c   : > { %p2907_p9 = pneg %p2906_p7 }
 0x94e   : > { %p2912_p13 = pnand %p2911_p11, %p2907_p9 }
 0x950   : > { %2915 = shalt.err (!%p2912_p13)
}
 0x951   : > { %s3013_s22 = smov 128   ;;  %s3014_s26 = smov 8   ;;  %v2500_v42 = vld [vmem:[%s685_s27] ss:$0 sm:$0xff] }
 0x952   : > { %2720 = dma.vmem_to_hbm [thread:$0]  (%p3131_p4), %s3520_s1, 256, %s3517_s24, %s2179_s3, %s3013_s22, %s3013_s22, %s3014_s26  }
 0x953   : > { %v2501_v43 = vld [vmem:[%s688_s20] ss:$0 sm:$0xff]  ;;  %s2194_s3 = sshll.u32 %s3227_s0, 4  ;;  %s3684_s18 = sld [smem:[#allocation26_spill]]  ;;  %s3569_s3 = int_to_ptr.vmem [resolvable:$true] %s2194_s3 }
 0x954   : > { %s2174_s15 = scalar_lea.sflag [#allocation5], %s3681_s25  ;;  %s2916_s20 = scalar_lea.vmem %s3569_s3, 256 }
 0x955   : > { %p2917_p0 = scmp.ne.s32.totalorder %s3569_s3, %s2916_s20  ;;  %s3015_s14 = smov [#allocation6]  }
 0x956   : > { %s2920_s19 = sshll.u32 %s3015_s14, 4  ;;  %s2921_s19 = int_to_ptr.vmem [resolvable:$false] %s2920_s19 }
 0x957   : > { %p2918_p1 = pnand %p2917_p0, %p3131_p4  ;;  %p2923_p3 = scmp.lt.s32.totalorder %s3569_s3, %s2921_s19 }
 0x959   : > { %s3685_s21 = smov %s3684_s18  ;;  %s3567_s17 = scalar_lea.hbm %s3684_s18, %s2514_s23 }
 0x95a   : > { %p2919_p2 = pneg %p2918_p1  ;;  %s2922_s23 = scalar_lea.vmem %s2921_s19, 512 }
 0x95b   : > { %p2924_p5 = scmp.lt.s32.totalorder %s2922_s23, %s2916_s20 }
 0x95d   : > { %p2925_p6 = por %p2924_p5, %p2923_p3 }
 0x95f   : > { %p2926_p7 = pnand %p2925_p6, %p2919_p2 }
 0x9ca   : > { %v2139_v34 = vpop.xlane.xlu0 %2138 }
 0x9cb   : > { %v2143_v37 = vmul.f32 0.03125, %v2139_v34 }
 0x9cd   : > { %v2145_v6 = vadd.f32 1e-12, %v2143_v37 }
 0x9ce   : > { %v2142_v38 = vpop.xlane.xlu1 %2141 }
 0x9cf   : > { %2860 = vrsqrt.f32 %v2145_v6  ;;  %v2144_v39 = vmul.f32 0.03125, %v2142_v38 }
 0x9d1   : > { %v2146_v40 = vadd.f32 1e-12, %v2144_v39 }
 0x9d3   : > { %2862 = vrsqrt.f32 %v2146_v40 }
 0x9dc   : > { %v2861_v41 = vpop.eup %2860 }
 0x9dd   : > { %v2149_v36 = vmul.f32 %v2861_v41, %v2133_v25 }
 0x9df   : > { %v2157_v44 = vmul.f32 %v2500_v42, %v2149_v36 }
 0x9e0   : > { %v2863_v45 = vpop.eup %2862 }
 0x9e1   : > { %v2150_v46 = vmul.f32 %v2863_v45, %v2134_v29  ;;  %v2165_v47 = vadd.f32 %v2501_v43, %v2157_v44 }
 0x9e3   : > { %v2158_v22 = vmul.f32 %v2500_v42, %v2150_v46  ;;  %2167 = vst.msk [vmem:[#allocation2] sm:$0xff] %vm727_vm2, %v2165_v47  ;;  %2169 = vst.msk [vmem:[%s3227_s0] sm:$0xff] %vm727_vm2, %v2165_v47 }
 0x9e5   : > { %v2166_v23 = vadd.f32 %v2501_v43, %v2158_v22 }
 0x9e7   : > { %2168 = vst.msk [vmem:[#allocation2 + $0x8] sm:$0xff] %vm727_vm2, %v2166_v23  ;;  %2170 = vst.msk [vmem:[%s3227_s0 + $0x8] sm:$0xff] %vm727_vm2, %v2166_v23 }
 0x9e8   : > { %2929 = shalt.err (!%p2926_p7)
}
 0x9e9   : > { %s2930_s0 = scalar_lea.hbm %s3567_s17, 256  ;;  %s2934_s30 = scalar_lea.hbm %s3685_s21, 512 }
 0x9ea   : > { %p2931_p9 = scmp.ne.s32.totalorder %s3567_s17, %s2930_s0  ;;  %p2935_p11 = scmp.lt.s32.totalorder %s3567_s17, %s3685_s21 }
 0x9eb   : > { %p2936_p13 = scmp.lt.s32.totalorder %s2934_s30, %s2930_s0 }
 0x9ec   : > { %p2932_p12 = pnand %p2931_p9, %p3131_p4 }
 0x9ed   : > { %p2937_p0 = por %p2936_p13, %p2935_p11 }
 0x9ee   : > { %p2933_p10 = pneg %p2932_p12 }
 0x9f0   : > { %p2938_p1 = pnand %p2937_p0, %p2933_p10 }
 0x9f2   : > { %2941 = shalt.err (!%p2938_p1)
}
 0x9f3   : > { %2719 = dma.vmem_to_hbm [thread:$0]  (%p3131_p4), %s3569_s3, 256, %s3567_s17, %s2174_s15, %s3013_s22, %s3013_s22, %s3014_s26  }
 0x9f4 PF: > { %s3686_s27 = sld [smem:[#allocation17_spill]] }
 0x9f5   : > { %s3687_s13 = sld [smem:[#allocation12_spill]] }
 0x9fa   : > { %p2736_p2 = scmp.ge.s32.totalorder %s3686_s27, 2 }
 0x9fb   : > { %s2227_s20 = sand.u32 1, %s3687_s13  }
 0x9fc   : > { %p2728_p3 = pnand %p2736_p2, %p3138_p8  ;;  %s2228_s14 = scalar_lea.sflag [#allocation5], %s2227_s20 }
 0x9fe   : > { %p2729_p5 = pneg %p2728_p3 }
 0xa00   : > { %2971 = dma.done.wait (%p2729_p5), %s2228_s14, 256  }
 0xa01   : > { %2973 = vsyncadd (%p2729_p5), %s2228_s14, 4294967040  ;;  %s2237_s19 = scalar_lea.sflag [#allocation8], %s2227_s20 }
 0xa02   : > { %2975 = dma.done.wait (%p2729_p5), %s2237_s19, 256  }
 0xa03   : > { %2977 = vsyncadd (%p2729_p5), %s2237_s19, 4294967040  ;;  %s32_s18 = sadd.s32 1, %s3686_s27   ;;  %s3689_s29 = sld [smem:[#allocation13_spill]] }
 0xa04   : > { %p29_p6 = scmp.ge.s32.totalorder %s32_s18, 4   ;;  %s3690_s30 = sld [smem:[#allocation14_spill]] }
 0xa05   : > { %s3691_s15 = sld [smem:[#allocation21_spill]] }
 0xa06   : > { %s3692_s16 = sld [smem:[#allocation16_spill]]  ;;  %31 = sbr.rel (!%p29_p6) target bundleno = 13 (0xd), region = 170 }
 0xa07   : > { %s3693_s17 = sld [smem:[#allocation18_spill]] }
 0xa0b   :  { %2242 = vsyncpa [#allocation4], 1 }
 0xa0c   :  { %2244 = vsyncpa [#allocation4 + $0x1], 1 }
 0xa0d   :  { %2245 = vsyncpa [#allocation5], 1 }
 0xa0e   :  { %2247 = vsyncpa [#allocation5 + $0x1], 1 }
 0xa0f   :  { %2248 = vsyncpa [#allocation8], 1 }
 0xa10   :  { %2250 = vsyncpa [#allocation8 + $0x1], 1 }

</bundles_post_ra>
